<compile_context>
chip_gen: v5e
topology: v5e:2x2
jax: 0.10.0
libtpu: 0.0.40
codegen_flags: <defaults>
</compile_context>

<pallas_src>
import jax
import jax.numpy as jnp
from jax import lax
from jax.experimental import pallas as pl
from jax.experimental.pallas import tpu as pltpu

LANE = 128
SUBLANE = 8


def _round_up(v, m):
    return ((v + m - 1) // m) * m


# ----------------------------- Pallas kernel ---------------------------------
def make_tcn_kernel(NB, L, layers, pad0, cmax):
    """layers: list of dicts with static K, d, Cpi, Cpo, identity."""
    n_w = sum(4 if m["identity"] else 6 for m in layers)

    def kernel(x_ref, *rest):
        w_refs = rest[:n_w]
        o_ref = rest[n_w]
        xs_ref, ys_ref = rest[n_w + 1], rest[n_w + 2]

        # Causal zero history (rows [0, pad0) are never overwritten by layers).
        if pad0 > 0:
            zeros_pad = jnp.zeros((NB, pad0, cmax), jnp.float32)
            xs_ref[:, :pad0, :] = zeros_pad
            ys_ref[:, :pad0, :] = zeros_pad

        x = x_ref[...].reshape(NB * L, layers[0]["Cpi"])      # f32 (NB*L, C)

        wi = 0
        for m in layers:
            K, d, Cpi, Cpo = m["K"], m["d"], m["Cpi"], m["Cpo"]
            w1_ref, b1_ref, w2_ref, b2_ref = w_refs[wi:wi + 4]
            wi += 4

            # ---- residual path ----
            if m["identity"]:
                res = x                                       # nn.Identity
            else:
                wres_ref, bres_ref = w_refs[wi:wi + 2]
                wi += 2
                res = jnp.dot(x, wres_ref[...],
                              preferred_element_type=jnp.float32) + bres_ref[...]

            # ---- causal dilated conv1: K tap-wise MXU matmuls, M = NB*L ----
            xs_ref[:, pad0:pad0 + L, :Cpi] = x.reshape(NB, L, Cpi)
            acc = jnp.zeros((NB * L, Cpo), jnp.float32)
            for k in range(K):
                s = pad0 - (K - 1 - k) * d                    # static offset
                tap = xs_ref[:, s:s + L, :Cpi].reshape(NB * L, Cpi)
                acc = acc + jnp.dot(tap, w1_ref[k],
                                    preferred_element_type=jnp.float32)
            y1 = jnp.maximum(acc + b1_ref[...], 0.0)
            # TODO(synk): nn.Dropout treated as identity (inference semantics).

            # ---- causal dilated conv2 ----
            ys_ref[:, pad0:pad0 + L, :Cpo] = y1.reshape(NB, L, Cpo)
            acc = jnp.zeros((NB * L, Cpo), jnp.float32)
            for k in range(K):
                s = pad0 - (K - 1 - k) * d
                tap = ys_ref[:, s:s + L, :Cpo].reshape(NB * L, Cpo)
                acc = acc + jnp.dot(tap, w2_ref[k],
                                    preferred_element_type=jnp.float32)
            y2 = jnp.maximum(acc + b2_ref[...], 0.0)

            x = y2 + res                                      # stays in VMEM/vregs

        o_ref[...] = x.reshape(NB, L, layers[-1]["Cpo"]).astype(o_ref.dtype)

    return kernel


# --------------------------- sizing helpers -----------------------------------
def _vmem_capacity_bytes():
    try:
        return int(pltpu.get_tpu_info().vmem_capacity_bytes)
    except Exception:
        return 128 * 1024 * 1024            # conservative fallback


def _pick_nb(N, L, layers, pad0, cmax):
    """Batch rows per grid step, sized to the actual generation's VMEM."""
    vmem_cap = _vmem_capacity_bytes()
    budget = int(vmem_cap * 0.4)            # headroom for compiler scratch

    weight_bytes = 0
    for m in layers:
        K, Cpi, Cpo = m["K"], m["Cpi"], m["Cpo"]
        wb = K * Cpi * Cpo + K * Cpo * Cpo + 2 * Cpo
        if not m["identity"]:
            wb += Cpi * Cpo + Cpo
        weight_bytes += 2 * wb * 4          # double-buffered f32

    def vmem_bytes(nb):
        io = 2 * nb * L * (layers[0]["Cpi"] + layers[-1]["Cpo"]) * 4   # dbl-buffered blocks
        stage = 2 * nb * (L + pad0) * cmax * 4                         # xs + ys scratch
        live = 5 * nb * L * cmax * 4                                   # x / acc / y / res temps
        return io + stage + live + weight_bytes

    cap = max(1, (N + 1) // 2)              # keep grid length >= 2 (v7x: 2 TCs)
    nb = 1
    while nb * 2 <= cap and vmem_bytes(nb * 2) <= budget:
        nb *= 2
    return nb, vmem_cap


# --------------------------- parameters / wrapper -----------------------------
def init_tcn_params(key, num_inputs, num_channels, kernel_size):
    """Deterministic synthetic init (shapes match the module's nn.Conv1d)."""
    params = []
    Cin = num_inputs
    for Cout in num_channels:
        key, k0, k1, k2, k3, k4, k5 = jax.random.split(key, 7)
        b1v = 1.0 / (Cin * kernel_size) ** 0.5
        b2v = 1.0 / (Cout * kernel_size) ** 0.5
        w1 = jax.random.uniform(k0, (kernel_size, Cin, Cout), jnp.float32, -b1v, b1v)
        b1 = jax.random.uniform(k1, (1, Cout), jnp.float32, -b1v, b1v)
        w2 = jax.random.uniform(k2, (kernel_size, Cout, Cout), jnp.float32, -b2v, b2v)
        b2 = jax.random.uniform(k3, (1, Cout), jnp.float32, -b2v, b2v)
        if Cin != Cout:                                       # 1x1 residual conv
            brv = 1.0 / Cin ** 0.5
            wres = jax.random.uniform(k4, (Cin, Cout), jnp.float32, -brv, brv)
            bres = jax.random.uniform(k5, (1, Cout), jnp.float32, -brv, brv)
        else:                                                 # nn.Identity
            wres, bres = None, None
        params.append((w1, b1, w2, b2, wres, bres))
        Cin = Cout
    return params


def prepare_tcn_params(raw_params):
    """Zero-pad channels to lane width (padded lanes MUST stay exactly zero)."""
    prepped = []
    for (w1, b1, w2, b2, wres, bres) in raw_params:
        K, Cin, Cout = w1.shape
        Cpi, Cpo = _round_up(Cin, LANE), _round_up(Cout, LANE)
        w1p = jnp.zeros((K, Cpi, Cpo), jnp.float32).at[:, :Cin, :Cout].set(w1)
        b1p = jnp.zeros((1, Cpo), jnp.float32).at[:, :Cout].set(b1)
        w2p = jnp.zeros((K, Cpo, Cpo), jnp.float32).at[:, :Cout, :Cout].set(w2)
        b2p = jnp.zeros((1, Cpo), jnp.float32).at[:, :Cout].set(b2)
        if wres is None:
            wrp = brp = None
        else:
            wrp = jnp.zeros((Cpi, Cpo), jnp.float32).at[:Cin, :Cout].set(wres)
            brp = jnp.zeros((1, Cpo), jnp.float32).at[:, :Cout].set(bres)
        prepped.append(dict(w1=w1p, b1=b1p, w2=w2p, b2=b2p, wres=wrp, bres=brp,
                            K=K, Cin=Cin, Cout=Cout, Cpi=Cpi, Cpo=Cpo))
    return prepped


def _const_spec(shape):
    nd = len(shape)
    return pl.BlockSpec(shape, lambda g: (0,) * nd)


def tcn_forward(x_ncl, prepped):
    """x_ncl: (N, C, L) like PyTorch. Returns (N, C_out, L) float32."""
    N, C0, L = x_ncl.shape
    layers = [dict(K=p["K"], d=2 ** i, Cpi=p["Cpi"], Cpo=p["Cpo"],
                   identity=p["wres"] is None) for i, p in enumerate(prepped)]
    Cp0, CpF = layers[0]["Cpi"], layers[-1]["Cpo"]
    cmax = max(max(m["Cpi"], m["Cpo"]) for m in layers)
    max_pad = max((m["K"] - 1) * m["d"] for m in layers)
    pad0 = _round_up(max_pad, SUBLANE) if max_pad > 0 else 0   # sublane-aligned data offset

    x = jnp.transpose(x_ncl, (0, 2, 1)).astype(jnp.float32)    # (N, L, C) channels-last
    if Cp0 > C0:
        x = jnp.pad(x, ((0, 0), (0, 0), (0, Cp0 - C0)))        # lane-dense channels

    NB, vmem_cap = _pick_nb(N, L, layers, pad0, cmax)
    n_steps = pl.cdiv(N, NB)
    Npad = n_steps * NB
    if Npad > N:                                               # partial last block -> pad
        x = jnp.pad(x, ((0, Npad - N), (0, 0), (0, 0)))

    in_arrays = [x]
    in_specs = [pl.BlockSpec((NB, L, Cp0), lambda g: (g, 0, 0))]
    for p in prepped:
        for name in ("w1", "b1", "w2", "b2", "wres", "bres"):
            arr = p[name]
            if arr is None:
                continue
            in_arrays.append(arr)
            in_specs.append(_const_spec(arr.shape))

    kernel = make_tcn_kernel(NB, L, layers, pad0, cmax)

    out = pl.pallas_call(
        kernel,
        out_shape=jax.ShapeDtypeStruct((Npad, L, CpF), jnp.float32),
        grid_spec=pltpu.PrefetchScalarGridSpec(
            num_scalar_prefetch=0,
            grid=(n_steps,),
            in_specs=in_specs,
            out_specs=pl.BlockSpec((NB, L, CpF), lambda g: (g, 0, 0)),
            scratch_shapes=[
                pltpu.VMEM((NB, pad0 + L, cmax), jnp.float32),  # conv1 causal staging
                pltpu.VMEM((NB, pad0 + L, cmax), jnp.float32),  # conv2 causal staging
            ],
        ),
        compiler_params=pltpu.CompilerParams(
            dimension_semantics=("parallel",),
            vmem_limit_bytes=int(vmem_cap * 0.75),
        ),
    )(*in_arrays)

    Cout = prepped[-1]["Cout"]
    out = out[:N, :, :Cout]
    return jnp.transpose(out, (0, 2, 1))                       # back to (N, C, L)


# ----------------------- pure-JAX reference (all f32) -------------------------
def _ref_causal_conv(x_ncl, w_kio, b, d):
    K = w_kio.shape[0]
    w_oik = jnp.transpose(w_kio, (2, 1, 0))
    y = lax.conv_general_dilated(
        x_ncl, w_oik, window_strides=(1,),
        padding=[((K - 1) * d, 0)], rhs_dilation=(d,),
        dimension_numbers=("NCH", "OIH", "NCH"))
    return y + b.reshape(1, -1, 1)


def _ref_forward(x_ncl, raw_params):
    x = x_ncl.astype(jnp.float32)
    for i, (w1, b1, w2, b2, wres, bres) in enumerate(raw_params):
        d = 2 ** i
        if wres is None:
            res = x
        else:
            res = jnp.einsum("ncl,co->nol", x, wres) + bres.reshape(1, -1, 1)
        h = jax.nn.relu(_ref_causal_conv(x, w1, b1, d))
        h = jax.nn.relu(_ref_causal_conv(h, w2, b2, d))
        x = h + res
    return x


if __name__ == "__main__":
    key = jax.random.PRNGKey(0)
    kx, kp = jax.random.split(key)

    num_inputs = 4
    num_channels = [8, 8]     # block 0: 4->8 (conv residual), block 1: 8->8 (identity)
    kernel_size = 3
    N, L = 2, 16

    x = jax.random.normal(kx, (N, num_inputs, L), dtype=jnp.float32)   # PyTorch NCL
    raw_params = init_tcn_params(kp, num_inputs, num_channels, kernel_size)
    params = prepare_tcn_params(raw_params)

    out = tcn_forward(x, params)
    out = jax.block_until_ready(out)

    ref = _ref_forward(x, raw_params)
    assert out.shape == (N, num_channels[-1], L)
    max_err = float(jnp.max(jnp.abs(out - ref)))
    assert jnp.allclose(out, ref, atol=5e-2, rtol=5e-2), f"max abs err {max_err}"

    print("KERNEL_OK")
</pallas_src>

<mosaic_0001>
module attributes {stable_mosaic.version = 11 : i64} {
  func.func @kernel(%arg0: i32, %arg1: memref<1x16x128xf32, #tpu.memory_space<vmem>>, %arg2: memref<3x128x128xf32, #tpu.memory_space<vmem>>, %arg3: memref<1x128xf32, #tpu.memory_space<vmem>>, %arg4: memref<3x128x128xf32, #tpu.memory_space<vmem>>, %arg5: memref<1x128xf32, #tpu.memory_space<vmem>>, %arg6: memref<128x128xf32, #tpu.memory_space<vmem>>, %arg7: memref<1x128xf32, #tpu.memory_space<vmem>>, %arg8: memref<3x128x128xf32, #tpu.memory_space<vmem>>, %arg9: memref<1x128xf32, #tpu.memory_space<vmem>>, %arg10: memref<3x128x128xf32, #tpu.memory_space<vmem>>, %arg11: memref<1x128xf32, #tpu.memory_space<vmem>>, %arg12: memref<1x16x128xf32, #tpu.memory_space<vmem>>, %arg13: memref<1x24x128xf32, #tpu.memory_space<vmem>>, %arg14: memref<1x24x128xf32, #tpu.memory_space<vmem>>) attributes {dimension_semantics = [#tpu.dimension_semantics<parallel>], iteration_bounds = array<i64: 2>, scalar_prefetch = 0 : i64, scratch_operands = 2 : i64, tpu.core_type = #tpu.core_type<tc>, window_params = [{transform_indices = @transform_0, window_bounds = array<i64: 1, 16, 128>}, {pipeline_mode = #tpu.pipeline_mode<synchronous>, transform_indices = @transform_1, window_bounds = array<i64: 3, 128, 128>}, {pipeline_mode = #tpu.pipeline_mode<synchronous>, transform_indices = @transform_2, window_bounds = array<i64: 1, 128>}, {pipeline_mode = #tpu.pipeline_mode<synchronous>, transform_indices = @transform_3, window_bounds = array<i64: 3, 128, 128>}, {pipeline_mode = #tpu.pipeline_mode<synchronous>, transform_indices = @transform_4, window_bounds = array<i64: 1, 128>}, {pipeline_mode = #tpu.pipeline_mode<synchronous>, transform_indices = @transform_5, window_bounds = array<i64: 128, 128>}, {pipeline_mode = #tpu.pipeline_mode<synchronous>, transform_indices = @transform_6, window_bounds = array<i64: 1, 128>}, {pipeline_mode = #tpu.pipeline_mode<synchronous>, transform_indices = @transform_7, window_bounds = array<i64: 3, 128, 128>}, {pipeline_mode = #tpu.pipeline_mode<synchronous>, transform_indices = @transform_8, window_bounds = array<i64: 1, 128>}, {pipeline_mode = #tpu.pipeline_mode<synchronous>, transform_indices = @transform_9, window_bounds = array<i64: 3, 128, 128>}, {pipeline_mode = #tpu.pipeline_mode<synchronous>, transform_indices = @transform_10, window_bounds = array<i64: 1, 128>}, {transform_indices = @transform_11, window_bounds = array<i64: 1, 16, 128>}]} {
    %cst = arith.constant 0.000000e+00 : f32
    %0 = vector.broadcast %cst : f32 to vector<1x8x128xf32>
    %c0 = arith.constant 0 : index
    %c0_0 = arith.constant 0 : index
    %c0_1 = arith.constant 0 : index
    %1 = vector.load %arg13[%c0, %c0_0, %c0_1] : memref<1x24x128xf32, #tpu.memory_space<vmem>>, vector<1x8x128xf32>
    tpu.vector_store %arg13[%c0, %c0_0, %c0_1], %0 {strides = array<i32>} : memref<1x24x128xf32, #tpu.memory_space<vmem>>, vector<1x8x128xf32>,
    %c0_2 = arith.constant 0 : index
    %c0_3 = arith.constant 0 : index
    %c0_4 = arith.constant 0 : index
    %2 = vector.load %arg14[%c0_2, %c0_3, %c0_4] : memref<1x24x128xf32, #tpu.memory_space<vmem>>, vector<1x8x128xf32>
    tpu.vector_store %arg14[%c0_2, %c0_3, %c0_4], %0 {strides = array<i32>} : memref<1x24x128xf32, #tpu.memory_space<vmem>>, vector<1x8x128xf32>,
    %c0_5 = arith.constant 0 : index
    %c0_6 = arith.constant 0 : index
    %c0_7 = arith.constant 0 : index
    %3 = vector.load %arg1[%c0_5, %c0_6, %c0_7] : memref<1x16x128xf32, #tpu.memory_space<vmem>>, vector<1x16x128xf32>
    %4 = vector.shape_cast %3 : vector<1x16x128xf32> to vector<16x128xf32>
    %c0_8 = arith.constant 0 : index
    %c0_9 = arith.constant 0 : index
    %5 = vector.load %arg6[%c0_8, %c0_9] : memref<128x128xf32, #tpu.memory_space<vmem>>, vector<128x128xf32>
    %cst_10 = arith.constant dense<0.000000e+00> : vector<16x128xf32>
    %6 = tpu.matmul %4, %5, %cst_10 {dimension_numbers = #tpu.dot_dimension_numbers<[1], [0], [0], [1], [0, 0, 1, 1], [], []>} : vector<16x128xf32>, vector<128x128xf32>, vector<16x128xf32> -> vector<16x128xf32>
    %c0_11 = arith.constant 0 : index
    %c0_12 = arith.constant 0 : index
    %7 = vector.load %arg7[%c0_11, %c0_12] : memref<1x128xf32, #tpu.memory_space<vmem>>, vector<1x128xf32>
    %8 = vector.broadcast %7 : vector<1x128xf32> to vector<16x128xf32>
    %9 = arith.addf %6, %8 : vector<16x128xf32>
    %10 = vector.shape_cast %4 : vector<16x128xf32> to vector<1x16x128xf32>
    %c0_13 = arith.constant 0 : index
    %c8 = arith.constant 8 : index
    %c0_14 = arith.constant 0 : index
    %11 = vector.load %arg13[%c0_13, %c8, %c0_14] : memref<1x24x128xf32, #tpu.memory_space<vmem>>, vector<1x16x128xf32>
    tpu.vector_store %arg13[%c0_13, %c8, %c0_14], %10 {strides = array<i32>} : memref<1x24x128xf32, #tpu.memory_space<vmem>>, vector<1x16x128xf32>,
    %cst_15 = arith.constant 0.000000e+00 : f32
    %12 = vector.broadcast %cst_15 : f32 to vector<16x128xf32>
    %c0_16 = arith.constant 0 : index
    %c6 = arith.constant 6 : index
    %c0_17 = arith.constant 0 : index
    %13 = vector.load %arg13[%c0_16, %c6, %c0_17] : memref<1x24x128xf32, #tpu.memory_space<vmem>>, vector<1x16x128xf32>
    %14 = vector.shape_cast %13 : vector<1x16x128xf32> to vector<16x128xf32>
    %c0_18 = arith.constant 0 : index
    %c0_19 = arith.constant 0 : index
    %c0_20 = arith.constant 0 : index
    %15 = vector.load %arg2[%c0_18, %c0_19, %c0_20] : memref<3x128x128xf32, #tpu.memory_space<vmem>>, vector<1x128x128xf32>
    %16 = vector.shape_cast %15 : vector<1x128x128xf32> to vector<128x128xf32>
    %cst_21 = arith.constant dense<0.000000e+00> : vector<16x128xf32>
    %17 = tpu.matmul %14, %16, %cst_21 {dimension_numbers = #tpu.dot_dimension_numbers<[1], [0], [0], [1], [0, 0, 1, 1], [], []>} : vector<16x128xf32>, vector<128x128xf32>, vector<16x128xf32> -> vector<16x128xf32>
    %18 = arith.addf %12, %17 : vector<16x128xf32>
    %c0_22 = arith.constant 0 : index
    %c7 = arith.constant 7 : index
    %c0_23 = arith.constant 0 : index
    %19 = vector.load %arg13[%c0_22, %c7, %c0_23] : memref<1x24x128xf32, #tpu.memory_space<vmem>>, vector<1x16x128xf32>
    %20 = vector.shape_cast %19 : vector<1x16x128xf32> to vector<16x128xf32>
    %c1 = arith.constant 1 : index
    %c0_24 = arith.constant 0 : index
    %c0_25 = arith.constant 0 : index
    %21 = vector.load %arg2[%c1, %c0_24, %c0_25] : memref<3x128x128xf32, #tpu.memory_space<vmem>>, vector<1x128x128xf32>
    %22 = vector.shape_cast %21 : vector<1x128x128xf32> to vector<128x128xf32>
    %cst_26 = arith.constant dense<0.000000e+00> : vector<16x128xf32>
    %23 = tpu.matmul %20, %22, %cst_26 {dimension_numbers = #tpu.dot_dimension_numbers<[1], [0], [0], [1], [0, 0, 1, 1], [], []>} : vector<16x128xf32>, vector<128x128xf32>, vector<16x128xf32> -> vector<16x128xf32>
    %24 = arith.addf %18, %23 : vector<16x128xf32>
    %c0_27 = arith.constant 0 : index
    %c8_28 = arith.constant 8 : index
    %c0_29 = arith.constant 0 : index
    %25 = vector.load %arg13[%c0_27, %c8_28, %c0_29] : memref<1x24x128xf32, #tpu.memory_space<vmem>>, vector<1x16x128xf32>
    %26 = vector.shape_cast %25 : vector<1x16x128xf32> to vector<16x128xf32>
    %c2 = arith.constant 2 : index
    %c0_30 = arith.constant 0 : index
    %c0_31 = arith.constant 0 : index
    %27 = vector.load %arg2[%c2, %c0_30, %c0_31] : memref<3x128x128xf32, #tpu.memory_space<vmem>>, vector<1x128x128xf32>
    %28 = vector.shape_cast %27 : vector<1x128x128xf32> to vector<128x128xf32>
    %cst_32 = arith.constant dense<0.000000e+00> : vector<16x128xf32>
    %29 = tpu.matmul %26, %28, %cst_32 {dimension_numbers = #tpu.dot_dimension_numbers<[1], [0], [0], [1], [0, 0, 1, 1], [], []>} : vector<16x128xf32>, vector<128x128xf32>, vector<16x128xf32> -> vector<16x128xf32>
    %30 = arith.addf %24, %29 : vector<16x128xf32>
    %c0_33 = arith.constant 0 : index
    %c0_34 = arith.constant 0 : index
    %31 = vector.load %arg3[%c0_33, %c0_34] : memref<1x128xf32, #tpu.memory_space<vmem>>, vector<1x128xf32>
    %32 = vector.broadcast %31 : vector<1x128xf32> to vector<16x128xf32>
    %33 = arith.addf %30, %32 : vector<16x128xf32>
    %cst_35 = arith.constant 0.000000e+00 : f32
    %34 = vector.broadcast %cst_35 : f32 to vector<16x128xf32>
    %35 = arith.maximumf %33, %34 : vector<16x128xf32>
    %36 = vector.shape_cast %35 : vector<16x128xf32> to vector<1x16x128xf32>
    %c0_36 = arith.constant 0 : index
    %c8_37 = arith.constant 8 : index
    %c0_38 = arith.constant 0 : index
    %37 = vector.load %arg14[%c0_36, %c8_37, %c0_38] : memref<1x24x128xf32, #tpu.memory_space<vmem>>, vector<1x16x128xf32>
    tpu.vector_store %arg14[%c0_36, %c8_37, %c0_38], %36 {strides = array<i32>} : memref<1x24x128xf32, #tpu.memory_space<vmem>>, vector<1x16x128xf32>,
    %cst_39 = arith.constant 0.000000e+00 : f32
    %38 = vector.broadcast %cst_39 : f32 to vector<16x128xf32>
    %c0_40 = arith.constant 0 : index
    %c6_41 = arith.constant 6 : index
    %c0_42 = arith.constant 0 : index
    %39 = vector.load %arg14[%c0_40, %c6_41, %c0_42] : memref<1x24x128xf32, #tpu.memory_space<vmem>>, vector<1x16x128xf32>
    %40 = vector.shape_cast %39 : vector<1x16x128xf32> to vector<16x128xf32>
    %c0_43 = arith.constant 0 : index
    %c0_44 = arith.constant 0 : index
    %c0_45 = arith.constant 0 : index
    %41 = vector.load %arg4[%c0_43, %c0_44, %c0_45] : memref<3x128x128xf32, #tpu.memory_space<vmem>>, vector<1x128x128xf32>
    %42 = vector.shape_cast %41 : vector<1x128x128xf32> to vector<128x128xf32>
    %cst_46 = arith.constant dense<0.000000e+00> : vector<16x128xf32>
    %43 = tpu.matmul %40, %42, %cst_46 {dimension_numbers = #tpu.dot_dimension_numbers<[1], [0], [0], [1], [0, 0, 1, 1], [], []>} : vector<16x128xf32>, vector<128x128xf32>, vector<16x128xf32> -> vector<16x128xf32>
    %44 = arith.addf %38, %43 : vector<16x128xf32>
    %c0_47 = arith.constant 0 : index
    %c7_48 = arith.constant 7 : index
    %c0_49 = arith.constant 0 : index
    %45 = vector.load %arg14[%c0_47, %c7_48, %c0_49] : memref<1x24x128xf32, #tpu.memory_space<vmem>>, vector<1x16x128xf32>
    %46 = vector.shape_cast %45 : vector<1x16x128xf32> to vector<16x128xf32>
    %c1_50 = arith.constant 1 : index
    %c0_51 = arith.constant 0 : index
    %c0_52 = arith.constant 0 : index
    %47 = vector.load %arg4[%c1_50, %c0_51, %c0_52] : memref<3x128x128xf32, #tpu.memory_space<vmem>>, vector<1x128x128xf32>
    %48 = vector.shape_cast %47 : vector<1x128x128xf32> to vector<128x128xf32>
    %cst_53 = arith.constant dense<0.000000e+00> : vector<16x128xf32>
    %49 = tpu.matmul %46, %48, %cst_53 {dimension_numbers = #tpu.dot_dimension_numbers<[1], [0], [0], [1], [0, 0, 1, 1], [], []>} : vector<16x128xf32>, vector<128x128xf32>, vector<16x128xf32> -> vector<16x128xf32>
    %50 = arith.addf %44, %49 : vector<16x128xf32>
    %c0_54 = arith.constant 0 : index
    %c8_55 = arith.constant 8 : index
    %c0_56 = arith.constant 0 : index
    %51 = vector.load %arg14[%c0_54, %c8_55, %c0_56] : memref<1x24x128xf32, #tpu.memory_space<vmem>>, vector<1x16x128xf32>
    %52 = vector.shape_cast %51 : vector<1x16x128xf32> to vector<16x128xf32>
    %c2_57 = arith.constant 2 : index
    %c0_58 = arith.constant 0 : index
    %c0_59 = arith.constant 0 : index
    %53 = vector.load %arg4[%c2_57, %c0_58, %c0_59] : memref<3x128x128xf32, #tpu.memory_space<vmem>>, vector<1x128x128xf32>
    %54 = vector.shape_cast %53 : vector<1x128x128xf32> to vector<128x128xf32>
    %cst_60 = arith.constant dense<0.000000e+00> : vector<16x128xf32>
    %55 = tpu.matmul %52, %54, %cst_60 {dimension_numbers = #tpu.dot_dimension_numbers<[1], [0], [0], [1], [0, 0, 1, 1], [], []>} : vector<16x128xf32>, vector<128x128xf32>, vector<16x128xf32> -> vector<16x128xf32>
    %56 = arith.addf %50, %55 : vector<16x128xf32>
    %c0_61 = arith.constant 0 : index
    %c0_62 = arith.constant 0 : index
    %57 = vector.load %arg5[%c0_61, %c0_62] : memref<1x128xf32, #tpu.memory_space<vmem>>, vector<1x128xf32>
    %58 = vector.broadcast %57 : vector<1x128xf32> to vector<16x128xf32>
    %59 = arith.addf %56, %58 : vector<16x128xf32>
    %cst_63 = arith.constant 0.000000e+00 : f32
    %60 = vector.broadcast %cst_63 : f32 to vector<16x128xf32>
    %61 = arith.maximumf %59, %60 : vector<16x128xf32>
    %62 = arith.addf %61, %9 : vector<16x128xf32>
    %63 = vector.shape_cast %62 : vector<16x128xf32> to vector<1x16x128xf32>
    %c0_64 = arith.constant 0 : index
    %c8_65 = arith.constant 8 : index
    %c0_66 = arith.constant 0 : index
    %64 = vector.load %arg13[%c0_64, %c8_65, %c0_66] : memref<1x24x128xf32, #tpu.memory_space<vmem>>, vector<1x16x128xf32>
    tpu.vector_store %arg13[%c0_64, %c8_65, %c0_66], %63 {strides = array<i32>} : memref<1x24x128xf32, #tpu.memory_space<vmem>>, vector<1x16x128xf32>,
    %cst_67 = arith.constant 0.000000e+00 : f32
    %65 = vector.broadcast %cst_67 : f32 to vector<16x128xf32>
    %c0_68 = arith.constant 0 : index
    %c4 = arith.constant 4 : index
    %c0_69 = arith.constant 0 : index
    %66 = vector.load %arg13[%c0_68, %c4, %c0_69] : memref<1x24x128xf32, #tpu.memory_space<vmem>>, vector<1x16x128xf32>
    %67 = vector.shape_cast %66 : vector<1x16x128xf32> to vector<16x128xf32>
    %c0_70 = arith.constant 0 : index
    %c0_71 = arith.constant 0 : index
    %c0_72 = arith.constant 0 : index
    %68 = vector.load %arg8[%c0_70, %c0_71, %c0_72] : memref<3x128x128xf32, #tpu.memory_space<vmem>>, vector<1x128x128xf32>
    %69 = vector.shape_cast %68 : vector<1x128x128xf32> to vector<128x128xf32>
    %cst_73 = arith.constant dense<0.000000e+00> : vector<16x128xf32>
    %70 = tpu.matmul %67, %69, %cst_73 {dimension_numbers = #tpu.dot_dimension_numbers<[1], [0], [0], [1], [0, 0, 1, 1], [], []>} : vector<16x128xf32>, vector<128x128xf32>, vector<16x128xf32> -> vector<16x128xf32>
    %71 = arith.addf %65, %70 : vector<16x128xf32>
    %c0_74 = arith.constant 0 : index
    %c6_75 = arith.constant 6 : index
    %c0_76 = arith.constant 0 : index
    %72 = vector.load %arg13[%c0_74, %c6_75, %c0_76] : memref<1x24x128xf32, #tpu.memory_space<vmem>>, vector<1x16x128xf32>
    %73 = vector.shape_cast %72 : vector<1x16x128xf32> to vector<16x128xf32>
    %c1_77 = arith.constant 1 : index
    %c0_78 = arith.constant 0 : index
    %c0_79 = arith.constant 0 : index
    %74 = vector.load %arg8[%c1_77, %c0_78, %c0_79] : memref<3x128x128xf32, #tpu.memory_space<vmem>>, vector<1x128x128xf32>
    %75 = vector.shape_cast %74 : vector<1x128x128xf32> to vector<128x128xf32>
    %cst_80 = arith.constant dense<0.000000e+00> : vector<16x128xf32>
    %76 = tpu.matmul %73, %75, %cst_80 {dimension_numbers = #tpu.dot_dimension_numbers<[1], [0], [0], [1], [0, 0, 1, 1], [], []>} : vector<16x128xf32>, vector<128x128xf32>, vector<16x128xf32> -> vector<16x128xf32>
    %77 = arith.addf %71, %76 : vector<16x128xf32>
    %c0_81 = arith.constant 0 : index
    %c8_82 = arith.constant 8 : index
    %c0_83 = arith.constant 0 : index
    %78 = vector.load %arg13[%c0_81, %c8_82, %c0_83] : memref<1x24x128xf32, #tpu.memory_space<vmem>>, vector<1x16x128xf32>
    %79 = vector.shape_cast %78 : vector<1x16x128xf32> to vector<16x128xf32>
    %c2_84 = arith.constant 2 : index
    %c0_85 = arith.constant 0 : index
    %c0_86 = arith.constant 0 : index
    %80 = vector.load %arg8[%c2_84, %c0_85, %c0_86] : memref<3x128x128xf32, #tpu.memory_space<vmem>>, vector<1x128x128xf32>
    %81 = vector.shape_cast %80 : vector<1x128x128xf32> to vector<128x128xf32>
    %cst_87 = arith.constant dense<0.000000e+00> : vector<16x128xf32>
    %82 = tpu.matmul %79, %81, %cst_87 {dimension_numbers = #tpu.dot_dimension_numbers<[1], [0], [0], [1], [0, 0, 1, 1], [], []>} : vector<16x128xf32>, vector<128x128xf32>, vector<16x128xf32> -> vector<16x128xf32>
    %83 = arith.addf %77, %82 : vector<16x128xf32>
    %c0_88 = arith.constant 0 : index
    %c0_89 = arith.constant 0 : index
    %84 = vector.load %arg9[%c0_88, %c0_89] : memref<1x128xf32, #tpu.memory_space<vmem>>, vector<1x128xf32>
    %85 = vector.broadcast %84 : vector<1x128xf32> to vector<16x128xf32>
    %86 = arith.addf %83, %85 : vector<16x128xf32>
    %cst_90 = arith.constant 0.000000e+00 : f32
    %87 = vector.broadcast %cst_90 : f32 to vector<16x128xf32>
    %88 = arith.maximumf %86, %87 : vector<16x128xf32>
    %89 = vector.shape_cast %88 : vector<16x128xf32> to vector<1x16x128xf32>
    %c0_91 = arith.constant 0 : index
    %c8_92 = arith.constant 8 : index
    %c0_93 = arith.constant 0 : index
    %90 = vector.load %arg14[%c0_91, %c8_92, %c0_93] : memref<1x24x128xf32, #tpu.memory_space<vmem>>, vector<1x16x128xf32>
    tpu.vector_store %arg14[%c0_91, %c8_92, %c0_93], %89 {strides = array<i32>} : memref<1x24x128xf32, #tpu.memory_space<vmem>>, vector<1x16x128xf32>,
    %cst_94 = arith.constant 0.000000e+00 : f32
    %91 = vector.broadcast %cst_94 : f32 to vector<16x128xf32>
    %c0_95 = arith.constant 0 : index
    %c4_96 = arith.constant 4 : index
    %c0_97 = arith.constant 0 : index
    %92 = vector.load %arg14[%c0_95, %c4_96, %c0_97] : memref<1x24x128xf32, #tpu.memory_space<vmem>>, vector<1x16x128xf32>
    %93 = vector.shape_cast %92 : vector<1x16x128xf32> to vector<16x128xf32>
    %c0_98 = arith.constant 0 : index
    %c0_99 = arith.constant 0 : index
    %c0_100 = arith.constant 0 : index
    %94 = vector.load %arg10[%c0_98, %c0_99, %c0_100] : memref<3x128x128xf32, #tpu.memory_space<vmem>>, vector<1x128x128xf32>
    %95 = vector.shape_cast %94 : vector<1x128x128xf32> to vector<128x128xf32>
    %cst_101 = arith.constant dense<0.000000e+00> : vector<16x128xf32>
    %96 = tpu.matmul %93, %95, %cst_101 {dimension_numbers = #tpu.dot_dimension_numbers<[1], [0], [0], [1], [0, 0, 1, 1], [], []>} : vector<16x128xf32>, vector<128x128xf32>, vector<16x128xf32> -> vector<16x128xf32>
    %97 = arith.addf %91, %96 : vector<16x128xf32>
    %c0_102 = arith.constant 0 : index
    %c6_103 = arith.constant 6 : index
    %c0_104 = arith.constant 0 : index
    %98 = vector.load %arg14[%c0_102, %c6_103, %c0_104] : memref<1x24x128xf32, #tpu.memory_space<vmem>>, vector<1x16x128xf32>
    %99 = vector.shape_cast %98 : vector<1x16x128xf32> to vector<16x128xf32>
    %c1_105 = arith.constant 1 : index
    %c0_106 = arith.constant 0 : index
    %c0_107 = arith.constant 0 : index
    %100 = vector.load %arg10[%c1_105, %c0_106, %c0_107] : memref<3x128x128xf32, #tpu.memory_space<vmem>>, vector<1x128x128xf32>
    %101 = vector.shape_cast %100 : vector<1x128x128xf32> to vector<128x128xf32>
    %cst_108 = arith.constant dense<0.000000e+00> : vector<16x128xf32>
    %102 = tpu.matmul %99, %101, %cst_108 {dimension_numbers = #tpu.dot_dimension_numbers<[1], [0], [0], [1], [0, 0, 1, 1], [], []>} : vector<16x128xf32>, vector<128x128xf32>, vector<16x128xf32> -> vector<16x128xf32>
    %103 = arith.addf %97, %102 : vector<16x128xf32>
    %c0_109 = arith.constant 0 : index
    %c8_110 = arith.constant 8 : index
    %c0_111 = arith.constant 0 : index
    %104 = vector.load %arg14[%c0_109, %c8_110, %c0_111] : memref<1x24x128xf32, #tpu.memory_space<vmem>>, vector<1x16x128xf32>
    %105 = vector.shape_cast %104 : vector<1x16x128xf32> to vector<16x128xf32>
    %c2_112 = arith.constant 2 : index
    %c0_113 = arith.constant 0 : index
    %c0_114 = arith.constant 0 : index
    %106 = vector.load %arg10[%c2_112, %c0_113, %c0_114] : memref<3x128x128xf32, #tpu.memory_space<vmem>>, vector<1x128x128xf32>
    %107 = vector.shape_cast %106 : vector<1x128x128xf32> to vector<128x128xf32>
    %cst_115 = arith.constant dense<0.000000e+00> : vector<16x128xf32>
    %108 = tpu.matmul %105, %107, %cst_115 {dimension_numbers = #tpu.dot_dimension_numbers<[1], [0], [0], [1], [0, 0, 1, 1], [], []>} : vector<16x128xf32>, vector<128x128xf32>, vector<16x128xf32> -> vector<16x128xf32>
    %109 = arith.addf %103, %108 : vector<16x128xf32>
    %c0_116 = arith.constant 0 : index
    %c0_117 = arith.constant 0 : index
    %110 = vector.load %arg11[%c0_116, %c0_117] : memref<1x128xf32, #tpu.memory_space<vmem>>, vector<1x128xf32>
    %111 = vector.broadcast %110 : vector<1x128xf32> to vector<16x128xf32>
    %112 = arith.addf %109, %111 : vector<16x128xf32>
    %cst_118 = arith.constant 0.000000e+00 : f32
    %113 = vector.broadcast %cst_118 : f32 to vector<16x128xf32>
    %114 = arith.maximumf %112, %113 : vector<16x128xf32>
    %115 = arith.addf %114, %62 : vector<16x128xf32>
    %116 = vector.shape_cast %115 : vector<16x128xf32> to vector<1x16x128xf32>
    %c0_119 = arith.constant 0 : index
    %c0_120 = arith.constant 0 : index
    %c0_121 = arith.constant 0 : index
    %117 = vector.load %arg12[%c0_119, %c0_120, %c0_121] : memref<1x16x128xf32, #tpu.memory_space<vmem>>, vector<1x16x128xf32>
    tpu.vector_store %arg12[%c0_119, %c0_120, %c0_121], %116 {strides = array<i32>} : memref<1x16x128xf32, #tpu.memory_space<vmem>>, vector<1x16x128xf32>,
    return
  }
  func.func @transform_0(%arg0: i32) -> (i32, i32, i32) {
    %c0_i32 = arith.constant 0 : i32
    %c0_i32_0 = arith.constant 0 : i32
    %c0_i32_1 = arith.constant 0 : i32
    return %arg0, %c0_i32, %c0_i32_0 : i32, i32, i32
  }
  func.func @transform_1(%arg0: i32) -> (i32, i32, i32) {
    %c0_i32 = arith.constant 0 : i32
    %c0_i32_0 = arith.constant 0 : i32
    %c0_i32_1 = arith.constant 0 : i32
    %c0_i32_2 = arith.constant 0 : i32
    return %c0_i32, %c0_i32_0, %c0_i32_1 : i32, i32, i32
  }
  func.func @transform_2(%arg0: i32) -> (i32, i32) {
    %c0_i32 = arith.constant 0 : i32
    %c0_i32_0 = arith.constant 0 : i32
    %c0_i32_1 = arith.constant 0 : i32
    return %c0_i32, %c0_i32_0 : i32, i32
  }
  func.func @transform_3(%arg0: i32) -> (i32, i32, i32) {
    %c0_i32 = arith.constant 0 : i32
    %c0_i32_0 = arith.constant 0 : i32
    %c0_i32_1 = arith.constant 0 : i32
    %c0_i32_2 = arith.constant 0 : i32
    return %c0_i32, %c0_i32_0, %c0_i32_1 : i32, i32, i32
  }
  func.func @transform_4(%arg0: i32) -> (i32, i32) {
    %c0_i32 = arith.constant 0 : i32
    %c0_i32_0 = arith.constant 0 : i32
    %c0_i32_1 = arith.constant 0 : i32
    return %c0_i32, %c0_i32_0 : i32, i32
  }
  func.func @transform_5(%arg0: i32) -> (i32, i32) {
    %c0_i32 = arith.constant 0 : i32
    %c0_i32_0 = arith.constant 0 : i32
    %c0_i32_1 = arith.constant 0 : i32
    return %c0_i32, %c0_i32_0 : i32, i32
  }
  func.func @transform_6(%arg0: i32) -> (i32, i32) {
    %c0_i32 = arith.constant 0 : i32
    %c0_i32_0 = arith.constant 0 : i32
    %c0_i32_1 = arith.constant 0 : i32
    return %c0_i32, %c0_i32_0 : i32, i32
  }
  func.func @transform_7(%arg0: i32) -> (i32, i32, i32) {
    %c0_i32 = arith.constant 0 : i32
    %c0_i32_0 = arith.constant 0 : i32
    %c0_i32_1 = arith.constant 0 : i32
    %c0_i32_2 = arith.constant 0 : i32
    return %c0_i32, %c0_i32_0, %c0_i32_1 : i32, i32, i32
  }
  func.func @transform_8(%arg0: i32) -> (i32, i32) {
    %c0_i32 = arith.constant 0 : i32
    %c0_i32_0 = arith.constant 0 : i32
    %c0_i32_1 = arith.constant 0 : i32
    return %c0_i32, %c0_i32_0 : i32, i32
  }
  func.func @transform_9(%arg0: i32) -> (i32, i32, i32) {
    %c0_i32 = arith.constant 0 : i32
    %c0_i32_0 = arith.constant 0 : i32
    %c0_i32_1 = arith.constant 0 : i32
    %c0_i32_2 = arith.constant 0 : i32
    return %c0_i32, %c0_i32_0, %c0_i32_1 : i32, i32, i32
  }
  func.func @transform_10(%arg0: i32) -> (i32, i32) {
    %c0_i32 = arith.constant 0 : i32
    %c0_i32_0 = arith.constant 0 : i32
    %c0_i32_1 = arith.constant 0 : i32
    return %c0_i32, %c0_i32_0 : i32, i32
  }
  func.func @transform_11(%arg0: i32) -> (i32, i32, i32) {
    %c0_i32 = arith.constant 0 : i32
    %c0_i32_0 = arith.constant 0 : i32
    %c0_i32_1 = arith.constant 0 : i32
    return %arg0, %c0_i32, %c0_i32_0 : i32, i32, i32
  }
}

</mosaic_0001>

<bundles_post_ra>
// kernel: tpu_custom_call.1
= control target key start
LH: loop header
LB: loop body
LE: loop exit
PB: predicated region body
PF: predicated region fallthrough
CT: control target
= control target key end

     0   :  { %s1938_s0 = inlined_call_operand.hbm [shape: f32[2,16,128], index: 0, kind: input, shape index: {}]   ;;  %s1939_s1 = inlined_call_operand.hbm [shape: f32[3,128,128], index: 1, kind: input, shape index: {}]   ;;  %s1940_s2 = inlined_call_operand.vmem [shape: f32[1,128], index: 2, kind: input, shape index: {}]   ;;  %s1941_s3 = inlined_call_operand.hbm [shape: f32[3,128,128], index: 3, kind: input, shape index: {}]   ;;  %s1942_s4 = inlined_call_operand.vmem [shape: f32[1,128], index: 4, kind: input, shape index: {}]   ;;  %s1943_s5 = inlined_call_operand.hbm [shape: f32[128,128], index: 5, kind: input, shape index: {}]   ;;  %s1944_s6 = inlined_call_operand.vmem [shape: f32[1,128], index: 6, kind: input, shape index: {}]   ;;  %s1945_s7 = inlined_call_operand.hbm [shape: f32[3,128,128], index: 7, kind: input, shape index: {}]   ;;  %s1946_s8 = inlined_call_operand.vmem [shape: f32[1,128], index: 8, kind: input, shape index: {}]   ;;  %s1947_s9 = inlined_call_operand.hbm [shape: f32[3,128,128], index: 9, kind: input, shape index: {}]   ;;  %s1948_s10 = inlined_call_operand.vmem [shape: f32[1,128], index: 10, kind: input, shape index: {}]   ;;  %s1949_s11 = inlined_call_operand.hbm [shape: f32[2,16,128], index: 11, kind: output, shape index: {}]  }
   0x1   :  { %1952 = sst [smem:[#allocation21_spill]] %s1939_s1 }
   0x2   :  { %1953 = sst [smem:[#allocation22_spill]] %s1941_s3 }
   0x3   :  { %1954 = sst [smem:[#allocation23_spill]] %s1943_s5 }
   0x4   :  { %1955 = sst [smem:[#allocation24_spill]] %s1945_s7 }
   0x5   :  { %1956 = sst [smem:[#allocation25_spill]] %s1947_s9 }
   0x6   :  { %16 = vsyncpa [#allocation5], 0 }
   0x7   :  { %18 = vsyncpa [#allocation5 + $0x1], 0 }
   0x8   :  { %19 = vsyncpa [#allocation8], 0 }
   0x9   :  { %20 = vsyncpa [#allocation11], 0 }
   0xa   :  { %21 = vsyncpa [#allocation14], 0 }
   0xb   :  { %22 = vsyncpa [#allocation6], 0 }
   0xc   :  { %24 = vsyncpa [#allocation6 + $0x1], 0  ;;  %s1707_s17 = smov 0   ;;  %s1709_s18 = smov 0  }
   0xd   :  { %s1711_s19 = smov 0   ;;  %s1713_s20 = smov 0  }
   0xe LB: > { %s1957_s1 = sld [smem:[#allocation21_spill]]  ;;  %s1731_s24 = sadd.s32 4294967295, %s1635_s20   ;;  %s1635_s20 = sphi %s1713_s20, %s1974_s20   ;;  %s1631_s19 = sphi %s1711_s19, %s1973_s19   ;;  %s1627_s18 = sphi %s1709_s18, %s1972_s18   ;;  %s1623_s17 = sphi %s1707_s17, %s1971_s17  }
   0xf   : > { %p1229_p0 = scmp.ge.s32.totalorder %s1635_s20, 1  ;;  %p51_p1 = scmp.eq.s32.totalorder %s1731_s24, 0 }
  0x10   : > { %p297_p2 = scmp.lt.s32.totalorder %s1635_s20, 3  ;;  %s1637_s26 = smov [#allocation7]  }
  0x11   : > { %s310_s27 = sshll.u32 %s1637_s26, 4  ;;  %s1959_s5 = sld [smem:[#allocation23_spill]]  ;;  %s311_s27 = int_to_ptr.vmem [resolvable:$true] %s310_s27 }
  0x12   : > { %p1736_p3 = pnand %p1229_p0, %p297_p2  ;;  %s1961_s3 = sld [smem:[#allocation22_spill]] }
  0x13   : > { %s1638_s16 = smov [#allocation10]   ;;  %s1950_s22 = smov 128  }
  0x14   : > { %s308_s23 = sshll.u32 %s1957_s1, 4  ;;  %p1294_p4 = pneg %p1736_p3  ;;  %s309_s23 = int_to_ptr.hbm [resolvable:$true] %s308_s23 }
  0x15   : > { %s344_s21 = sshll.u32 %s1638_s16, 4  ;;  %s1951_s26 = smov 8   ;;  %s345_s21 = int_to_ptr.vmem [resolvable:$true] %s344_s21 }
  0x16   : > { %p1748_p6 = pnand %p1294_p4, %p51_p1  ;;  %s1962_s7 = sld [smem:[#allocation24_spill]] }
  0x17   : > { %s342_s30 = sshll.u32 %s1959_s5, 4  ;;  %s1641_s14 = smov [#allocation9]   ;;  %s343_s30 = int_to_ptr.hbm [resolvable:$true] %s342_s30 }
  0x18   : > { %s325_s15 = sshll.u32 %s1961_s3, 4  ;;  %s327_s16 = sshll.u32 %s1641_s14, 4  ;;  %s326_s15 = int_to_ptr.hbm [resolvable:$true] %s325_s15  ;;  %s328_s16 = int_to_ptr.vmem [resolvable:$true] %s327_s16 }
  0x19   : > { %1297 = dma.hbm_to_vmem [thread:$0]  (!%p1748_p6), %s309_s23, 6144, %s311_s27, [#allocation8], %s1950_s22, %s1950_s22, %s1951_s26  }
  0x1a   : > { %1303 = dma.hbm_to_vmem [thread:$0]  (!%p1748_p6), %s343_s30, 2048, %s345_s21, [#allocation11], %s1950_s22, %s1950_s22, %s1951_s26  }
  0x1b   : > { %1300 = dma.hbm_to_vmem [thread:$0]  (!%p1748_p6), %s326_s15, 6144, %s328_s16, [#allocation8], %s1950_s22, %s1950_s22, %s1951_s26  }
  0x1c   : > { %s359_s13 = sshll.u32 %s1962_s7, 4  ;;  %s1642_s23 = smov [#allocation12]   ;;  %s360_s13 = int_to_ptr.hbm [resolvable:$true] %s359_s13 }
  0x1d   : > { %s361_s27 = sshll.u32 %s1642_s23, 4  ;;  %s1963_s9 = sld [smem:[#allocation25_spill]]  ;;  %s362_s27 = int_to_ptr.vmem [resolvable:$true] %s361_s27 }
  0x1e   : > { %1306 = dma.hbm_to_vmem [thread:$0]  (!%p1748_p6), %s360_s13, 6144, %s362_s27, [#allocation11], %s1950_s22, %s1950_s22, %s1951_s26  }
  0x1f   : > { %s1643_s15 = smov [#allocation13]   ;;  %s1228_s14 = sadd.s32 4294967294, %s1635_s20  }
  0x20   : > { %s378_s29 = sshll.u32 %s1643_s15, 4  ;;  %s1788_s16 = sadd.s32 1, %s1635_s20   ;;  %s379_s29 = int_to_ptr.vmem [resolvable:$true] %s378_s29 }
  0x21   : > { %s37_s23 = sadd.s32 1, %s1631_s19  ;;  %s34_s30 = ssub.s32 %s1635_s20, %s1788_s16 }
  0x22   : > { %p44_p7 = scmp.ne.s32.totalorder %s1631_s19, %s1627_s18  ;;  %p35_p8 = scmp.eq.s32.totalorder %s34_s30, 0 }
  0x23   : > { %s376_s28 = sshll.u32 %s1963_s9, 4  ;;  %p45_p9 = scmp.eq.s32.totalorder %s1635_s20, 0  ;;  %s377_s28 = int_to_ptr.hbm [resolvable:$true] %s376_s28 }
  0x24   : > { %1309 = dma.hbm_to_vmem [thread:$0]  (!%p1748_p6), %s377_s28, 6144, %s379_s29, [#allocation14], %s1950_s22, %s1950_s22, %s1951_s26  }
  0x25   : > { %p50_p10 = scmp.ne.s32.totalorder %s1627_s18, %s1623_s17  ;;  %p284_p11 = scmp.eq.s32.totalorder %s1731_s24, 1 }
  0x26   : > { %s1800_s13 = scalar_select %p35_p8, %s1631_s19, %s37_s23  }
  0x27   : > { %p1804_p12 = por %p51_p1, %p50_p10  ;;  %p1808_p13 = por %p284_p11, %p44_p7 }
  0x28   : > { %p290_p0 = scmp.eq.s32.totalorder %s1228_s14, 1  ;;  %p46_p2 = por %p45_p9, %p44_p7 }
  0x29   : > { %s395_s21 = sand.u32 1, %s1631_s19   ;;  %p1323_p6 = scmp.lt.s32.totalorder %s1635_s20, 2 }
  0x2a   : > { %p1813_p4 = por %p290_p0, %p50_p10  ;;  %s1236_s15 = sshll.u32 %s395_s21, 4 }
  0x2b   : > { %s1252_s29 = sshll.u32 %s1635_s20, 4  ;;  %s399_s1 = scalar_lea.vmem [#allocation4], %s1236_s15 }
  0x2c   : > { %s404_s22 = scalar_lea.hbm %s1938_s0, %s1252_s29  ;;  %s407_s3 = sshll.u32 %s399_s1, 4  ;;  %s408_s3 = int_to_ptr.vmem [resolvable:$true] %s407_s3 }
  0x2d   : > { %s405_s26 = sshll.u32 %s404_s22, 4  ;;  %p1822_p8 = pnand %p1323_p6, %p46_p2  ;;  %s406_s26 = int_to_ptr.hbm [resolvable:$true] %s405_s26 }
  0x2e   : > { %s396_s5 = scalar_lea.sflag [#allocation5], %s395_s21  ;;  %s1527_s7 = sshra.s32 %s406_s26, 4  ;;  %s1528_s7 = int_to_ptr.hbm [resolvable:$true] %s1527_s7 }
  0x2f   : > { %s1529_s9 = scalar_lea.hbm %s1528_s7, 16  ;;  %p1531_p9 = pneg %p1822_p8 }
  0x30   : > { %p1530_p7 = scmp.ne.s32.totalorder %s1528_s7, %s1529_s9  ;;  %s1534_s1 = scalar_lea.hbm %s1938_s0, 32 }
  0x31   : > { %p1535_p0 = scmp.lt.s32.totalorder %s1528_s7, %s1938_s0  ;;  %p1536_p2 = scmp.lt.s32.totalorder %s1534_s1, %s1529_s9 }
  0x32   : > { %p1532_p10 = pnand %p1531_p9, %p1530_p7 }
  0x33   : > { %p1537_p6 = por %p1536_p2, %p1535_p0 }
  0x34   : > { %p1533_p11 = pneg %p1532_p10 }
  0x36   : > { %p1538_p5 = pnand %p1537_p6, %p1533_p11 }
  0x38   : > { %1541 = shalt.err (!%p1538_p5)
}
  0x39   : > { %s1968_s21 = smov 8   ;;  %s1969_s30 = smov 128  }
  0x3a   : > { %1313 = dma.hbm_to_vmem [thread:$0]  (!%p1822_p8), %s406_s26, 256, %s408_s3, %s396_s5, %s1969_s30, %s1969_s30, %s1968_s21  }
  0x3b   : > { %419 = sbr.rel (%p1736_p3) target bundleno = 699 (0x2bb), region = 64  ;;  %s1842_s29 = sand.u32 (!%p1736_p3), 1, %s1627_s18  }
  0x3c   : > { %s1240_s7 = sshll.u32 (!%p1736_p3), %s1842_s29, 4  ;;  %s422_s9 = scalar_lea.sflag (!%p1736_p3), [#allocation5], %s1842_s29 }
  0x3d   : > { %s1848_s22 = scalar_lea.vmem (!%p1736_p3), [#allocation4], %s1240_s7 }
  0x40   : > { %1602 = dma.done.wait (%p1804_p12), %s422_s9, 256  }
  0x41   : > { %1604 = vsyncadd (%p1804_p12), %s422_s9, 4294967040 }
  0x42   : > { %1606 = dma.done.wait (%p51_p1), [#allocation8], 12288  }
  0x43   : > { %1608 = vsyncadd (%p51_p1), [#allocation8], 4294955008 }
  0x44   : > { %1610 = dma.done.wait (%p51_p1), [#allocation11], 8192  }
  0x45   : > { %1612 = vsyncadd (%p51_p1), [#allocation11], 4294959104 }
  0x46   : > { %1614 = dma.done.wait (%p51_p1), [#allocation14], 6144  }
  0x47   : > { %1616 = vsyncadd (%p51_p1), [#allocation14], 4294961152  ;;  %v1644_v0 = vmov 0.0   ;;  %v556_v1 = vld [vmem:[#allocation7 + $0x78] sm:$0xff]  ;;  %v555_v2 = vld [vmem:[#allocation7 + $0x70] sm:$0xff]  ;;  %s1253_s30 = sshll.u32 %s1731_s24, 4 }
  0x48   : > { %490 = vst [vmem:[#allocation2] sm:$0xff] %v1644_v0  ;;  %v640_v3 = vld [vmem:[#allocation7 + $0x178] sm:$0xff]  ;;  %599 = vmatpush.msra.mxu2 %v556_v1  ;;  %v639_v4 = vld [vmem:[#allocation7 + $0x170] sm:$0xff]  ;;  %v554_v6 = vld [vmem:[#allocation7 + $0x68] sm:$0xff]  ;;  %s1103_s3 = scalar_lea.hbm %s1949_s11, %s1253_s30  ;;  %s489_s5 = scalar_lea.vmem [#allocation15], %s1240_s7 }
  0x49   : > { %491 = vst [vmem:[#allocation3] sm:$0xff] %v1644_v0  ;;  %641 = vmatpush.msra.mxu3 %v640_v3  ;;  %v575_v5 = vld [vmem:[#allocation7 + $0xf8] sm:$0xff]  ;;  %v638_v7 = vld [vmem:[#allocation7 + $0x168] sm:$0xff]  ;;  %v574_v8 = vld [vmem:[#allocation7 + $0xf0] sm:$0xff]  ;;  %s1104_s25 = sshll.u32 %s489_s5, 4  ;;  %s1106_s26 = sshll.u32 %s1103_s3, 4  ;;  %s1105_s25 = int_to_ptr.vmem [resolvable:$true] %s1104_s25  ;;  %s1107_s26 = int_to_ptr.hbm [resolvable:$true] %s1106_s26 }
  0x4a   : > { %576 = vmatpush.msra.mxu1 %v575_v5  ;;  %600 = vmatpush.msra.mxu2 %v555_v2  ;;  %v573_v9 = vld [vmem:[#allocation7 + $0xe8] sm:$0xff]  ;;  %v553_v10 = vld [vmem:[#allocation7 + $0x60] sm:$0xff]  ;;  %v552_v13 = vld [vmem:[#allocation7 + $0x58] sm:$0xff]  ;;  %s1092_s24 = scalar_lea.sflag [#allocation6], %s1842_s29  ;;  %s1571_s12 = sshra.s32 %s1107_s26, 4  ;;  %s1572_s12 = int_to_ptr.hbm [resolvable:$true] %s1571_s12 }
  0x4b   : > { %642 = vmatpush.msra.mxu3 %v639_v4  ;;  %v637_v11 = vld [vmem:[#allocation7 + $0x160] sm:$0xff]  ;;  %v636_v14 = vld [vmem:[#allocation7 + $0x158] sm:$0xff]  ;;  %v551_v16 = vld [vmem:[#allocation7 + $0x50] sm:$0xff]  ;;  %s1573_s14 = scalar_lea.hbm %s1572_s12, 16  ;;  %s1577_s15 = scalar_lea.hbm %s1949_s11, 32 }
  0x4c   : > { %577 = vmatpush.msra.mxu1 %v574_v8  ;;  %601 = vmatpush.msra.mxu2 %v554_v6  ;;  %v572_v12 = vld [vmem:[#allocation7 + $0xe0] sm:$0xff]  ;;  %v571_v15 = vld [vmem:[#allocation7 + $0xd8] sm:$0xff]  ;;  %v635_v17 = vld [vmem:[#allocation7 + $0x150] sm:$0xff]  ;;  %p1574_p1 = scmp.ne.s32.totalorder %s1572_s12, %s1573_s14  ;;  %p1578_p12 = scmp.lt.s32.totalorder %s1572_s12, %s1949_s11 }
  0x4d   : > { %643 = vmatpush.msra.mxu3 %v638_v7  ;;  %v570_v18 = vld [vmem:[#allocation7 + $0xd0] sm:$0xff]  ;;  %v550_v19 = vld [vmem:[#allocation7 + $0x48] sm:$0xff]  ;;  %v549_v22 = vld [vmem:[#allocation7 + $0x40] sm:$0xff]  ;;  %p1579_p8 = scmp.lt.s32.totalorder %s1577_s15, %s1573_s14 }
  0x4e   : > { %578 = vmatpush.msra.mxu1 %v573_v9  ;;  %602 = vmatpush.msra.mxu2 %v553_v10  ;;  %v634_v20 = vld [vmem:[#allocation7 + $0x148] sm:$0xff]  ;;  %v633_v23 = vld [vmem:[#allocation7 + $0x140] sm:$0xff]  ;;  %v548_v25 = vld [vmem:[#allocation7 + $0x38] sm:$0xff]  ;;  %p1575_p3 = pnand %p1574_p1, %p1808_p13 }
  0x4f   : > { %644 = vmatpush.msra.mxu3 %v637_v11  ;;  %v569_v21 = vld [vmem:[#allocation7 + $0xc8] sm:$0xff]  ;;  %v568_v24 = vld [vmem:[#allocation7 + $0xc0] sm:$0xff]  ;;  %v632_v26 = vld [vmem:[#allocation7 + $0x138] sm:$0xff]  ;;  %p1580_p7 = por %p1579_p8, %p1578_p12 }
  0x50   : > { %579 = vmatpush.msra.mxu1 %v572_v12  ;;  %603 = vmatpush.msra.mxu2 %v552_v13  ;;  %v1867_v27 = vld [vmem:[%s1848_s22] sm:$0xff]  ;;  %v567_v29 = vld [vmem:[#allocation7 + $0xb8] sm:$0xff]  ;;  %v546_v35 = vld [vmem:[#allocation7 + $0x28] sm:$0xff]  ;;  %p1576_p5 = pneg %p1575_p3 }
  0x51   : > { %645 = vmatpush.msra.mxu3 %v636_v14  ;;  %v547_v28 = vld [vmem:[#allocation7 + $0x30] sm:$0xff]  ;;  %537 = vst [vmem:[#allocation2 + $0x8] sm:$0xff] %v1867_v27  ;;  %v1871_v31 = vld [vmem:[%s1848_s22 + $0x8] sm:$0xff]  ;;  %v545_v39 = vld [vmem:[#allocation7 + $0x20] sm:$0xff] }
  0x52   : > { %580 = vmatpush.msra.mxu1 %v571_v15  ;;  %604 = vmatpush.msra.mxu2 %v551_v16  ;;  %v631_v30 = vld [vmem:[#allocation7 + $0x130] sm:$0xff]  ;;  %v509_v32 = vld [vmem:[#allocation10 + $0x78] sm:$0xff]  ;;  %538 = vst [vmem:[#allocation2 + $0x10] sm:$0xff] %v1871_v31  ;;  %v630_v36 = vld [vmem:[#allocation7 + $0x128] sm:$0xff]  ;;  %p1581_p9 = pnand %p1580_p7, %p1576_p5 }
  0x53   : > { %646 = vmatpush.msra.mxu3 %v635_v17  ;;  %v566_v33 = vld [vmem:[#allocation7 + $0xb0] sm:$0xff]  ;;  %514 = vmatpush.msra.mxu0 %v509_v32  ;;  %v565_v37 = vld [vmem:[#allocation7 + $0xa8] sm:$0xff]  ;;  %v629_v40 = vld [vmem:[#allocation7 + $0x120] sm:$0xff] }
  0x54   : > { %581 = vmatpush.msra.mxu1 %v570_v18  ;;  %605 = vmatpush.msra.mxu2 %v550_v19  ;;  %v508_v34 = vld [vmem:[#allocation10 + $0x70] sm:$0xff]  ;;  %v507_v38 = vld [vmem:[#allocation10 + $0x68] sm:$0xff]  ;;  %v564_v41 = vld [vmem:[#allocation7 + $0xa0] sm:$0xff] }
  0x55   : > { %647 = vmatpush.msra.mxu3 %v634_v20  ;;  %515 = vmatpush.msra.mxu0 %v508_v34  ;;  %v506_v42 = vld [vmem:[#allocation10 + $0x60] sm:$0xff]  ;;  %v544_v43 = vld [vmem:[#allocation7 + $0x18] sm:$0xff]  ;;  %v543_v47 = vld [vmem:[#allocation7 + $0x10] sm:$0xff] }
  0x56   : > { %582 = vmatpush.msra.mxu1 %v569_v21  ;;  %606 = vmatpush.msra.mxu2 %v549_v22  ;;  %v628_v44 = vld [vmem:[#allocation7 + $0x118] sm:$0xff]  ;;  %v627_v48 = vld [vmem:[#allocation7 + $0x110] sm:$0xff]  ;;  %v542_v51 = vld [vmem:[#allocation7 + $0x8] sm:$0xff] }
  0x57   : > { %648 = vmatpush.msra.mxu3 %v633_v23  ;;  %516 = vmatpush.msra.mxu0 %v507_v38  ;;  %v563_v45 = vld [vmem:[#allocation7 + $0x98] sm:$0xff]  ;;  %v562_v49 = vld [vmem:[#allocation7 + $0x90] sm:$0xff]  ;;  %v626_v52 = vld [vmem:[#allocation7 + $0x108] sm:$0xff] }
  0x58   : > { %583 = vmatpush.msra.mxu1 %v568_v24  ;;  %607 = vmatpush.msra.mxu2 %v548_v25  ;;  %v505_v46 = vld [vmem:[#allocation10 + $0x58] sm:$0xff]  ;;  %v504_v50 = vld [vmem:[#allocation10 + $0x50] sm:$0xff]  ;;  %v561_v53 = vld [vmem:[#allocation7 + $0x88] sm:$0xff] }
  0x59   : > { %649 = vmatpush.msra.mxu3 %v632_v26  ;;  %517 = vmatpush.msra.mxu0 %v506_v42  ;;  %v503_v54 = vld [vmem:[#allocation10 + $0x48] sm:$0xff]  ;;  %v541_v55 = vld [vmem:[#allocation7] sm:$0xff]  ;;  %v539_v58 = vld [vmem:[#allocation2 + $0x6] sm:$0xff] }
  0x5a   : > { %584 = vmatpush.msra.mxu1 %v567_v29  ;;  %608 = vmatpush.msra.mxu2 %v547_v28  ;;  %v625_v56 = vld [vmem:[#allocation7 + $0x100] sm:$0xff]  ;;  %v557_v60 = vld [vmem:[#allocation2 + $0x7] sm:$0xff]  ;;  %v775_v3 = vld [vmem:[#allocation9 + $0x168] sm:$0xff] }
  0x5b   : > { %650 = vmatpush.msra.mxu3 %v631_v30  ;;  %518 = vmatpush.msra.mxu0 %v505_v46  ;;  %v560_v57 = vld [vmem:[#allocation7 + $0x80] sm:$0xff]  ;;  %v777_v61 = vld [vmem:[#allocation9 + $0x178] sm:$0xff]  ;;  %v776_v0 = vld [vmem:[#allocation9 + $0x170] sm:$0xff] }
  0x5c   : > { %585 = vmatpush.msra.mxu1 %v566_v33  ;;  %609 = vmatpush.msra.mxu2 %v546_v35  ;;  %v502_v59 = vld [vmem:[#allocation10 + $0x40] sm:$0xff]  ;;  %v501_v62 = vld [vmem:[#allocation10 + $0x38] sm:$0xff]  ;;  %v500_v1 = vld [vmem:[#allocation10 + $0x30] sm:$0xff] }
  0x5d   : > { %651 = vmatpush.msra.mxu3 %v630_v36  ;;  %519 = vmatpush.msra.mxu0 %v504_v50  ;;  %v693_v63 = vld [vmem:[#allocation9 + $0x78] sm:$0xff]  ;;  %v692_v2 = vld [vmem:[#allocation9 + $0x70] sm:$0xff]  ;;  %v499_v4 = vld [vmem:[#allocation10 + $0x28] sm:$0xff] }
  0x5e   : > { %586 = vmatpush.msra.mxu1 %v565_v37  ;;  %610 = vmatpush.msra.mxu2 %v545_v39  ;;  %v691_v5 = vld [vmem:[#allocation9 + $0x68] sm:$0xff]  ;;  %v540_v6 = vld [vmem:[#allocation2 + $0xe] sm:$0xff]  ;;  %v496_v14 = vld [vmem:[#allocation10 + $0x10] sm:$0xff] }
  0x5f   : > { %652 = vmatpush.msra.mxu3 %v629_v40  ;;  %520 = vmatpush.msra.mxu0 %v503_v54  ;;  %v498_v7 = vld [vmem:[#allocation10 + $0x20] sm:$0xff]  ;;  %v497_v11 = vld [vmem:[#allocation10 + $0x18] sm:$0xff]  ;;  %v688_v15 = vld [vmem:[#allocation9 + $0x50] sm:$0xff] }
  0x60   : > { %587 = vmatpush.msra.mxu1 %v564_v41  ;;  %611 = vmatpush.msra.mxu2 %v544_v43  ;;  %v690_v8 = vld [vmem:[#allocation9 + $0x60] sm:$0xff]  ;;  %v689_v12 = vld [vmem:[#allocation9 + $0x58] sm:$0xff]  ;;  %v772_v16 = vld [vmem:[#allocation9 + $0x150] sm:$0xff] }
  0x61   : > { %653 = vmatpush.msra.mxu3 %v628_v44  ;;  %521 = vmatpush.msra.mxu0 %v502_v59  ;;  %v558_v9 = vld [vmem:[#allocation2 + $0xf] sm:$0xff]  ;;  %v495_v17 = vld [vmem:[#allocation10 + $0x8] sm:$0xff]  ;;  %v711_v22 = vld [vmem:[#allocation9 + $0xf0] sm:$0xff] }
  0x62   : > { %588 = vmatpush.msra.mxu1 %v563_v45  ;;  %612 = vmatpush.msra.mxu2 %v543_v47  ;;  %v774_v10 = vld [vmem:[#allocation9 + $0x160] sm:$0xff]  ;;  %v773_v13 = vld [vmem:[#allocation9 + $0x158] sm:$0xff]  ;;  %v687_v18 = vld [vmem:[#allocation9 + $0x48] sm:$0xff] }
  0x63   : > { %654 = vmatpush.msra.mxu3 %v627_v48  ;;  %522 = vmatpush.msra.mxu0 %v501_v62  ;;  %v771_v19 = vld [vmem:[#allocation9 + $0x148] sm:$0xff]  ;;  %v494_v20 = vld [vmem:[#allocation10] sm:$0xff]  ;;  %v712_v21 = vld [vmem:[#allocation9 + $0xf8] sm:$0xff] }
  0x64   : > { %589 = vmatpush.msra.mxu1 %v562_v49  ;;  %613 = vmatpush.msra.mxu2 %v542_v51  ;;  %v710_v23 = vld [vmem:[#allocation9 + $0xe8] sm:$0xff]  ;;  %v709_v24 = vld [vmem:[#allocation9 + $0xe0] sm:$0xff]  ;;  %v708_v25 = vld [vmem:[#allocation9 + $0xd8] sm:$0xff] }
  0x65   : > { %655 = vmatpush.msra.mxu3 %v626_v52  ;;  %523 = vmatpush.msra.mxu0 %v500_v1  ;;  %v707_v26 = vld [vmem:[#allocation9 + $0xd0] sm:$0xff]  ;;  %v706_v28 = vld [vmem:[#allocation9 + $0xc8] sm:$0xff]  ;;  %v770_v29 = vld [vmem:[#allocation9 + $0x140] sm:$0xff] }
  0x66   : > { %590 = vmatpush.msra.mxu1 %v561_v53  ;;  %614 = vmatpush.msra.mxu2 %v541_v55  ;;  %v769_v30 = vld [vmem:[#allocation9 + $0x138] sm:$0xff]  ;;  %v768_v32 = vld [vmem:[#allocation9 + $0x130] sm:$0xff]  ;;  %v767_v33 = vld [vmem:[#allocation9 + $0x128] sm:$0xff] }
  0x67   : > { %656 = vmatpush.msra.mxu3 %v625_v56  ;;  %615 = vmatmul.f32.vlgmr.msra.gmra.mxu2 %v539_v58  ;;  %v686_v34 = vld [vmem:[#allocation9 + $0x40] sm:$0xff]  ;;  %v704_v36 = vld [vmem:[#allocation9 + $0xb8] sm:$0xff]  ;;  %v684_v39 = vld [vmem:[#allocation9 + $0x30] sm:$0xff] }
  0x68   : > { %657 = vmatmul.f32.vlgmr.msra.gmra.mxu3 %v1867_v27  ;;  %591 = vmatpush.msra.mxu1 %v560_v57  ;;  %v766_v35 = vld [vmem:[#allocation9 + $0x120] sm:$0xff]  ;;  %v685_v37 = vld [vmem:[#allocation9 + $0x38] sm:$0xff]  ;;  %v764_v40 = vld [vmem:[#allocation9 + $0x110] sm:$0xff] }
  0x69   : > { %592 = vmatmul.f32.vlgmr.msra.gmra.mxu1 %v557_v60  ;;  %778 = vmatpush.msrb.mxu2 %v777_v61  ;;  %v765_v38 = vld [vmem:[#allocation9 + $0x118] sm:$0xff]  ;;  %v702_v41 = vld [vmem:[#allocation9 + $0xa8] sm:$0xff]  ;;  %v701_v44 = vld [vmem:[#allocation9 + $0xa0] sm:$0xff] }
  0x6a   : > { %736 = vmatpush.msrb.mxu1 %v693_v63  ;;  %524 = vmatpush.msra.mxu0 %v499_v4  ;;  %v683_v42 = vld [vmem:[#allocation9 + $0x28] sm:$0xff]  ;;  %v682_v45 = vld [vmem:[#allocation9 + $0x20] sm:$0xff]  ;;  %v700_v47 = vld [vmem:[#allocation9 + $0x98] sm:$0xff] }
  0x6b   : > { %779 = vmatpush.msrb.mxu2 %v776_v0  ;;  %v763_v43 = vld [vmem:[#allocation9 + $0x108] sm:$0xff]  ;;  %v762_v46 = vld [vmem:[#allocation9 + $0x100] sm:$0xff]  ;;  %v681_v48 = vld [vmem:[#allocation9 + $0x18] sm:$0xff] }
  0x6c   : > { %737 = vmatpush.msrb.mxu1 %v692_v2  ;;  %525 = vmatpush.msra.mxu0 %v498_v7  ;;  %v699_v49 = vld [vmem:[#allocation9 + $0x90] sm:$0xff]  ;;  %v698_v51 = vld [vmem:[#allocation9 + $0x88] sm:$0xff]  ;;  %v697_v53 = vld [vmem:[#allocation9 + $0x80] sm:$0xff] }
  0x6d   : > { %780 = vmatpush.msrb.mxu2 %v775_v3  ;;  %v680_v50 = vld [vmem:[#allocation9 + $0x10] sm:$0xff]  ;;  %v679_v52 = vld [vmem:[#allocation9 + $0x8] sm:$0xff]  ;;  %v678_v54 = vld [vmem:[#allocation9] sm:$0xff] }
  0x6e   : > { %738 = vmatpush.msrb.mxu1 %v691_v5  ;;  %526 = vmatpush.msra.mxu0 %v497_v11  ;;  %v851_v55 = vld [vmem:[#allocation12 + $0xf8] sm:$0xff]  ;;  %v850_v58 = vld [vmem:[#allocation12 + $0xf0] sm:$0xff]  ;;  %v849_v61 = vld [vmem:[#allocation12 + $0xe8] sm:$0xff] }
  0x6f   : > { %618 = vmatmul.f32.gmra.mxu2 %v540_v6  ;;  %v832_v56 = vld [vmem:[#allocation12 + $0x78] sm:$0xff]  ;;  %852 = vmatpush.msrb.mxu3 %v851_v55  ;;  %v831_v59 = vld [vmem:[#allocation12 + $0x70] sm:$0xff]  ;;  %v830_v62 = vld [vmem:[#allocation12 + $0x68] sm:$0xff] }
  0x70   : > { %660 = vmatmul.f32.gmra.mxu3 %v1871_v31  ;;  %739 = vmatpush.msrb.mxu1 %v690_v8  ;;  %v916_v57 = vld [vmem:[#allocation12 + $0x178] sm:$0xff]  ;;  %v915_v60 = vld [vmem:[#allocation12 + $0x170] sm:$0xff]  ;;  %v914_v0 = vld [vmem:[#allocation12 + $0x168] sm:$0xff] }
  0x71   : > { %595 = vmatmul.f32.gmra.mxu1 %v558_v9  ;;  %781 = vmatpush.msrb.mxu2 %v774_v10  ;;  %v848_v1 = vld [vmem:[#allocation12 + $0xe0] sm:$0xff]  ;;  %v1372_v7 = vld [vmem:[%s1940_s2] ss:$0 sm:$0xff]  ;;  %v837_v55 = vld [vmem:[#allocation12 + $0x88] sm:$0xff] }
  0x72   : > { %740 = vmatpush.msrb.mxu1 %v689_v12  ;;  %527 = vmatpush.msra.mxu0 %v496_v14  ;;  %v829_v2 = vld [vmem:[#allocation12 + $0x60] sm:$0xff] }
  0x73   : > { %782 = vmatpush.msrb.mxu2 %v773_v13  ;;  %853 = vmatpush.msrb.mxu3 %v850_v58  ;;  %v913_v3 = vld [vmem:[#allocation12 + $0x160] sm:$0xff] }
  0x74   : > { %741 = vmatpush.msrb.mxu1 %v688_v15  ;;  %528 = vmatpush.msra.mxu0 %v495_v17  ;;  %v817_v58 = vld [vmem:[#allocation12] sm:$0xff] }
  0x75   : > { %783 = vmatpush.msrb.mxu2 %v772_v16  ;;  %854 = vmatpush.msrb.mxu3 %v849_v61  ;;  %v969_v61 = vld [vmem:[#allocation13 + $0x78] sm:$0xff] }
  0x76   : > { %742 = vmatpush.msrb.mxu1 %v687_v18  ;;  %529 = vmatpush.msra.mxu0 %v494_v20 }
  0x77   : > { %784 = vmatpush.msrb.mxu2 %v771_v19  ;;  %530 = vmatmul.f32.vlgmr.msra.gmra.mxu0 %v1867_v27  ;;  %v705_v27 = vld [vmem:[#allocation9 + $0xc0] sm:$0xff] }
  0x78   : > { %713 = vmatpush.msrb.mxu0 %v712_v21  ;;  %743 = vmatpush.msrb.mxu1 %v686_v34  ;;  %v826_v34 = vld [vmem:[#allocation12 + $0x48] sm:$0xff] }
  0x79   : > { %785 = vmatpush.msrb.mxu2 %v770_v29  ;;  %855 = vmatpush.msrb.mxu3 %v848_v1  ;;  %v908_v29 = vld [vmem:[#allocation12 + $0x138] sm:$0xff]  ;;  %v1052_v1 = vld [vmem:[#allocation13 + $0x170] sm:$0xff] }
  0x7a   : > { %714 = vmatpush.msrb.mxu0 %v711_v22  ;;  %744 = vmatpush.msrb.mxu1 %v685_v37  ;;  %v912_v22 = vld [vmem:[#allocation12 + $0x158] sm:$0xff]  ;;  %v825_v37 = vld [vmem:[#allocation12 + $0x40] sm:$0xff] }
  0x7b   : > { %786 = vmatpush.msrb.mxu2 %v769_v30  ;;  %v846_v30 = vld [vmem:[#allocation12 + $0xd0] sm:$0xff] }
  0x7c   : > { %715 = vmatpush.msrb.mxu0 %v710_v23  ;;  %745 = vmatpush.msrb.mxu1 %v684_v39  ;;  %v911_v23 = vld [vmem:[#allocation12 + $0x150] sm:$0xff]  ;;  %v824_v39 = vld [vmem:[#allocation12 + $0x38] sm:$0xff] }
  0x7d   : > { %787 = vmatpush.msrb.mxu2 %v768_v32  ;;  %v827_v32 = vld [vmem:[#allocation12 + $0x50] sm:$0xff] }
  0x7e   : > { %716 = vmatpush.msrb.mxu0 %v709_v24  ;;  %746 = vmatpush.msrb.mxu1 %v683_v42  ;;  %v910_v24 = vld [vmem:[#allocation12 + $0x148] sm:$0xff]  ;;  %v823_v42 = vld [vmem:[#allocation12 + $0x30] sm:$0xff] }
  0x7f   : > { %533 = vmatmul.f32.gmra.mxu0 %v1871_v31  ;;  %788 = vmatpush.msrb.mxu2 %v767_v33  ;;  %v703_v31 = vld [vmem:[#allocation9 + $0xb0] sm:$0xff] }
  0x80   : > { %717 = vmatpush.msrb.mxu0 %v708_v25  ;;  %747 = vmatpush.msrb.mxu1 %v682_v45  ;;  %v909_v25 = vld [vmem:[#allocation12 + $0x140] sm:$0xff]  ;;  %v907_v33 = vld [vmem:[#allocation12 + $0x130] sm:$0xff]  ;;  %v822_v45 = vld [vmem:[#allocation12 + $0x28] sm:$0xff] }
  0x81   : > { %789 = vmatpush.msrb.mxu2 %v766_v35  ;;  %v906_v35 = vld [vmem:[#allocation12 + $0x128] sm:$0xff] }
  0x82   : > { %718 = vmatpush.msrb.mxu0 %v707_v26  ;;  %748 = vmatpush.msrb.mxu1 %v681_v48  ;;  %v847_v26 = vld [vmem:[#allocation12 + $0xd8] sm:$0xff]  ;;  %v821_v48 = vld [vmem:[#allocation12 + $0x20] sm:$0xff] }
  0x83   : > { %790 = vmatpush.msrb.mxu2 %v765_v38  ;;  %856 = vmatpush.msrb.mxu3 %v847_v26  ;;  %v905_v38 = vld [vmem:[#allocation12 + $0x120] sm:$0xff] }
  0x84   : > { %719 = vmatpush.msrb.mxu0 %v706_v28  ;;  %749 = vmatpush.msrb.mxu1 %v680_v50  ;;  %v828_v28 = vld [vmem:[#allocation12 + $0x58] sm:$0xff] }
  0x85   : > { %791 = vmatpush.msrb.mxu2 %v764_v40  ;;  %857 = vmatpush.msrb.mxu3 %v846_v30  ;;  %v904_v40 = vld [vmem:[#allocation12 + $0x118] sm:$0xff] }
  0x86   : > { %720 = vmatpush.msrb.mxu0 %v705_v27  ;;  %750 = vmatpush.msrb.mxu1 %v679_v52  ;;  %v845_v27 = vld [vmem:[#allocation12 + $0xc8] sm:$0xff]  ;;  %v820_v52 = vld [vmem:[#allocation12 + $0x18] sm:$0xff] }
  0x87   : > { %792 = vmatpush.msrb.mxu2 %v763_v43  ;;  %858 = vmatpush.msrb.mxu3 %v845_v27  ;;  %v903_v43 = vld [vmem:[#allocation12 + $0x110] sm:$0xff]  ;;  %v1049_v27 = vld [vmem:[#allocation13 + $0x158] sm:$0xff] }
  0x88   : > { %721 = vmatpush.msrb.mxu0 %v704_v36  ;;  %751 = vmatpush.msrb.mxu1 %v678_v54  ;;  %v844_v36 = vld [vmem:[#allocation12 + $0xc0] sm:$0xff]  ;;  %v819_v54 = vld [vmem:[#allocation12 + $0x10] sm:$0xff] }
  0x89   : > { %793 = vmatpush.msrb.mxu2 %v762_v46  ;;  %859 = vmatpush.msrb.mxu3 %v844_v36  ;;  %v902_v46 = vld [vmem:[#allocation12 + $0x108] sm:$0xff]  ;;  %v1046_v36 = vld [vmem:[#allocation13 + $0x140] sm:$0xff] }
  0x8a   : > { %722 = vmatpush.msrb.mxu0 %v703_v31  ;;  %917 = vmatpush.msra.mxu1 %v916_v57  ;;  %v843_v31 = vld [vmem:[#allocation12 + $0xb8] sm:$0xff]  ;;  %v836_v57 = vld [vmem:[#allocation12 + $0x80] sm:$0xff] }
  0x8b   : > { %860 = vmatpush.msrb.mxu3 %v843_v31  ;;  %v983_v31 = vld [vmem:[#allocation13 + $0xd0] sm:$0xff] }
  0x8c   : > { %723 = vmatpush.msrb.mxu0 %v702_v41  ;;  %918 = vmatpush.msra.mxu1 %v915_v60  ;;  %v842_v41 = vld [vmem:[#allocation12 + $0xb0] sm:$0xff]  ;;  %v988_v60 = vld [vmem:[#allocation13 + $0xf8] sm:$0xff] }
  0x8d   : > { %861 = vmatpush.msrb.mxu3 %v842_v41  ;;  %989 = vmatpush.msra.mxu2 %v988_v60  ;;  %v963_v41 = vld [vmem:[#allocation13 + $0x48] sm:$0xff]  ;;  %v976_v60 = vld [vmem:[#allocation13 + $0x98] sm:$0xff] }
  0x8e   : > { %724 = vmatpush.msrb.mxu0 %v701_v44  ;;  %919 = vmatpush.msra.mxu1 %v914_v0  ;;  %v841_v44 = vld [vmem:[#allocation12 + $0xa8] sm:$0xff]  ;;  %v968_v0 = vld [vmem:[#allocation13 + $0x70] sm:$0xff] }
  0x8f   : > { %862 = vmatpush.msrb.mxu3 %v841_v44  ;;  %v1043_v44 = vld [vmem:[#allocation13 + $0x128] sm:$0xff] }
  0x90   : > { %725 = vmatpush.msrb.mxu0 %v700_v47  ;;  %920 = vmatpush.msra.mxu1 %v913_v3  ;;  %v840_v47 = vld [vmem:[#allocation12 + $0xa0] sm:$0xff]  ;;  %v967_v3 = vld [vmem:[#allocation13 + $0x68] sm:$0xff] }
  0x91   : > { %863 = vmatpush.msrb.mxu3 %v840_v47  ;;  %v1042_v47 = vld [vmem:[#allocation13 + $0x120] sm:$0xff] }
  0x92   : > { %726 = vmatpush.msrb.mxu0 %v699_v49  ;;  %921 = vmatpush.msra.mxu1 %v912_v22  ;;  %v901_v49 = vld [vmem:[#allocation12 + $0x100] sm:$0xff] }
  0x94   : > { %727 = vmatpush.msrb.mxu0 %v698_v51  ;;  %922 = vmatpush.msra.mxu1 %v911_v23  ;;  %v839_v51 = vld [vmem:[#allocation12 + $0x98] sm:$0xff] }
  0x95   : > { %864 = vmatpush.msrb.mxu3 %v839_v51  ;;  %v979_v51 = vld [vmem:[#allocation13 + $0xb0] sm:$0xff] }
  0x96   : > { %728 = vmatpush.msrb.mxu0 %v697_v53  ;;  %923 = vmatpush.msra.mxu1 %v910_v24  ;;  %v838_v53 = vld [vmem:[#allocation12 + $0x90] sm:$0xff] }
  0x97   : > { %865 = vmatpush.msrb.mxu3 %v838_v53  ;;  %v1040_v53 = vld [vmem:[#allocation13 + $0x110] sm:$0xff] }
  0x98   : > { %875 = vmatpush.msra.mxu0 %v832_v56  ;;  %924 = vmatpush.msra.mxu1 %v909_v25  ;;  %v818_v56 = vld [vmem:[#allocation12 + $0x8] sm:$0xff] }
  0x99   : > { %866 = vmatpush.msrb.mxu3 %v837_v55  ;;  %v959_v55 = vld [vmem:[#allocation13 + $0x28] sm:$0xff] }
  0x9a   : > { %876 = vmatpush.msra.mxu0 %v831_v59  ;;  %925 = vmatpush.msra.mxu1 %v908_v29 }
  0x9b   : > { %867 = vmatpush.msrb.mxu3 %v836_v57  ;;  %v977_v57 = vld [vmem:[#allocation13 + $0xa0] sm:$0xff] }
  0x9c   : > { %877 = vmatpush.msra.mxu0 %v830_v62  ;;  %926 = vmatpush.msra.mxu1 %v907_v33  ;;  %v1053_v62 = vld [vmem:[#allocation13 + $0x178] sm:$0xff] }
  0x9d   : > { %1012 = vmatpush.msra.mxu3 %v969_v61  ;;  %v957_v61 = vld [vmem:[#allocation13 + $0x18] sm:$0xff] }
  0x9e   : > { %878 = vmatpush.msra.mxu0 %v829_v2  ;;  %927 = vmatpush.msra.mxu1 %v906_v35  ;;  %v986_v2 = vld [vmem:[#allocation13 + $0xe8] sm:$0xff] }
  0x9f   : > { %1013 = vmatpush.msra.mxu3 %v968_v0  ;;  %v1047_v35 = vld [vmem:[#allocation13 + $0x148] sm:$0xff] }
  0xa0   : > { %879 = vmatpush.msra.mxu0 %v828_v28  ;;  %928 = vmatpush.msra.mxu1 %v905_v38  ;;  %v965_v38 = vld [vmem:[#allocation13 + $0x58] sm:$0xff]  ;;  %v974_v0 = vld [vmem:[#allocation13 + $0x88] sm:$0xff] }
  0xa1   : > { %1014 = vmatpush.msra.mxu3 %v967_v3  ;;  %v954_v3 = vld [vmem:[#allocation13] sm:$0xff] }
  0xa2   : > { %880 = vmatpush.msra.mxu0 %v827_v32  ;;  %929 = vmatpush.msra.mxu1 %v904_v40  ;;  %v982_v40 = vld [vmem:[#allocation13 + $0xc8] sm:$0xff] }
  0xa4   : > { %881 = vmatpush.msra.mxu0 %v826_v34  ;;  %930 = vmatpush.msra.mxu1 %v903_v43  ;;  %v1048_v34 = vld [vmem:[#allocation13 + $0x150] sm:$0xff] }
  0xa5   : > { %v1044_v43 = vld [vmem:[#allocation13 + $0x130] sm:$0xff] }
  0xa6   : > { %882 = vmatpush.msra.mxu0 %v825_v37  ;;  %931 = vmatpush.msra.mxu1 %v902_v46  ;;  %v984_v37 = vld [vmem:[#allocation13 + $0xd8] sm:$0xff]  ;;  %v962_v46 = vld [vmem:[#allocation13 + $0x40] sm:$0xff] }
  0xa8   : > { %883 = vmatpush.msra.mxu0 %v824_v39  ;;  %932 = vmatpush.msra.mxu1 %v901_v49  ;;  %v964_v39 = vld [vmem:[#allocation13 + $0x50] sm:$0xff]  ;;  %v961_v49 = vld [vmem:[#allocation13 + $0x38] sm:$0xff] }
  0xaa   : > { %884 = vmatpush.msra.mxu0 %v823_v42  ;;  %v1045_v42 = vld [vmem:[#allocation13 + $0x138] sm:$0xff] }
  0xac   : > { %885 = vmatpush.msra.mxu0 %v822_v45  ;;  %v981_v45 = vld [vmem:[#allocation13 + $0xc0] sm:$0xff] }
  0xae   : > { %886 = vmatpush.msra.mxu0 %v821_v48  ;;  %v980_v48 = vld [vmem:[#allocation13 + $0xb8] sm:$0xff] }
  0xb0   : > { %887 = vmatpush.msra.mxu0 %v820_v52  ;;  %v960_v52 = vld [vmem:[#allocation13 + $0x30] sm:$0xff] }
  0xb2   : > { %888 = vmatpush.msra.mxu0 %v819_v54  ;;  %v978_v54 = vld [vmem:[#allocation13 + $0xa8] sm:$0xff] }
  0xb4   : > { %889 = vmatpush.msra.mxu0 %v818_v56  ;;  %v1039_v56 = vld [vmem:[#allocation13 + $0x108] sm:$0xff] }
  0xb6   : > { %890 = vmatpush.msra.mxu0 %v817_v58  ;;  %v958_v58 = vld [vmem:[#allocation13 + $0x20] sm:$0xff] }
  0xe6   : > { %v593_v63 = vpop.f32.mrf.mxu1 }
  0xea   : > { %v616_v4 = vpop.f32.mrf.mxu2 }
  0xeb   : > { %v658_v5 = vpop.f32.mrf.mxu3  ;;  %v617_v6 = vadd.f32 %v616_v4, %v593_v63  ;;  %v987_v63 = vld [vmem:[#allocation13 + $0xf0] sm:$0xff]  ;;  %v1051_v4 = vld [vmem:[#allocation13 + $0x168] sm:$0xff] }
  0xec   : > { %990 = vmatpush.msra.mxu2 %v987_v63  ;;  %v956_v63 = vld [vmem:[#allocation13 + $0x10] sm:$0xff] }
  0xed   : > { %v664_v8 = vadd.f32 %v658_v5, %v617_v6  ;;  %v985_v6 = vld [vmem:[#allocation13 + $0xe0] sm:$0xff] }
  0xee   : > { %v596_v10 = vpop.f32.mrf.mxu1  ;;  %991 = vmatpush.msra.mxu2 %v986_v2  ;;  %v973_v2 = vld [vmem:[#allocation13 + $0x80] sm:$0xff] }
  0xef   : > { %v670_v9 = vadd.f32 %v1372_v7, %v664_v8 }
  0xf0   : > { %992 = vmatpush.msra.mxu2 %v985_v6 }
  0xf1   : > { %v672_v11 = vmax.f32 %v670_v9, 0.0 }
  0xf2   : > { %v619_v12 = vpop.f32.mrf.mxu2  ;;  %993 = vmatpush.msra.mxu2 %v984_v37 }
  0xf3   : > { %v661_v13 = vpop.f32.mrf.mxu3  ;;  %674 = vst [vmem:[#allocation3 + $0x8] sm:$0xff] %v672_v11  ;;  %v620_v14 = vadd.f32 %v619_v12, %v596_v10  ;;  %794 = vmatmul.f32.vlgmr.msrb.gmra.mxu2 %v672_v11  ;;  %v1050_v10 = vld [vmem:[#allocation13 + $0x160] sm:$0xff]  ;;  %v1374_v12 = vld [vmem:[%s1942_s4] ss:$0 sm:$0xff] }
  0xf4   : > { %v531_v50 = vpop.f32.mrf.mxu0  ;;  %994 = vmatpush.msra.mxu2 %v983_v31 }
  0xf5   : > { %v665_v15 = vadd.f32 %v661_v13, %v620_v14  ;;  %v1373_v13 = vld [vmem:[%s1944_s6] ss:$0 sm:$0xff] }
  0xf6   : > { %995 = vmatpush.msra.mxu2 %v982_v40 }
  0xf7   : > { %v671_v16 = vadd.f32 %v1372_v7, %v665_v15  ;;  %v966_v7 = vld [vmem:[#allocation13 + $0x60] sm:$0xff] }
  0xf8   : > { %1015 = vmatpush.msra.mxu3 %v966_v7  ;;  %996 = vmatpush.msra.mxu2 %v981_v45 }
  0xf9   : > { %v673_v17 = vmax.f32 %v671_v16, 0.0  ;;  %v532_v16 = vadd.f32 %v1373_v13, %v531_v50  ;;  %v1041_v50 = vld [vmem:[#allocation13 + $0x118] sm:$0xff] }
  0xfa   : > { %v694_v18 = vld [vmem:[#allocation3 + $0x7] sm:$0xff]  ;;  %1016 = vmatpush.msra.mxu3 %v965_v38  ;;  %997 = vmatpush.msra.mxu2 %v980_v48 }
  0xfb   : > { %v676_v19 = vld [vmem:[#allocation3 + $0x6] sm:$0xff]  ;;  %675 = vst [vmem:[#allocation3 + $0x10] sm:$0xff] %v673_v17  ;;  %729 = vmatmul.f32.vlgmr.msrb.gmra.mxu0 %v694_v18  ;;  %797 = vmatmul.f32.gmra.mxu2 %v673_v17 }
  0xfc   : > { %752 = vmatmul.f32.vlgmr.msrb.gmra.mxu1 %v676_v19  ;;  %v534_v59 = vpop.f32.mrf.mxu0  ;;  %1054 = vmatpush.msrb.mxu0 %v1053_v62 }
  0xfd   : > { %1254 = vmatpush.msrb.mxu1 %v1053_v62  ;;  %v535_v25 = vadd.f32 %v1373_v13, %v534_v59  ;;  %1017 = vmatpush.msra.mxu3 %v964_v39  ;;  %v1038_v59 = vld [vmem:[#allocation13 + $0x100] sm:$0xff]  ;;  %v975_v62 = vld [vmem:[#allocation13 + $0x90] sm:$0xff] }
  0xfe   : > { %1055 = vmatpush.msrb.mxu0 %v1052_v1  ;;  %998 = vmatpush.msra.mxu2 %v979_v51 }
  0xff   : > { %1255 = vmatpush.msrb.mxu1 %v1052_v1  ;;  %1018 = vmatpush.msra.mxu3 %v963_v41  ;;  %v955_v1 = vld [vmem:[#allocation13 + $0x8] sm:$0xff] }
 0x100   : > { %1056 = vmatpush.msrb.mxu0 %v1051_v4  ;;  %999 = vmatpush.msra.mxu2 %v978_v54 }
 0x101   : > { %1256 = vmatpush.msrb.mxu1 %v1051_v4  ;;  %1019 = vmatpush.msra.mxu3 %v962_v46 }
 0x102   : > { %v695_v20 = vld [vmem:[#allocation3 + $0xf] sm:$0xff]  ;;  %1057 = vmatpush.msrb.mxu0 %v1050_v10  ;;  %1000 = vmatpush.msra.mxu2 %v977_v57 }
 0x103   : > { %v677_v21 = vld [vmem:[#allocation3 + $0xe] sm:$0xff]  ;;  %732 = vmatmul.f32.gmra.mxu0 %v695_v20  ;;  %1257 = vmatpush.msrb.mxu1 %v1050_v10 }
 0x104   : > { %755 = vmatmul.f32.gmra.mxu1 %v677_v21  ;;  %1058 = vmatpush.msrb.mxu0 %v1049_v27 }
 0x105   : > { %1258 = vmatpush.msrb.mxu1 %v1049_v27  ;;  %1020 = vmatpush.msra.mxu3 %v961_v49 }
 0x106   : > { %1059 = vmatpush.msrb.mxu0 %v1048_v34  ;;  %1001 = vmatpush.msra.mxu2 %v976_v60 }
 0x107   : > { %1259 = vmatpush.msrb.mxu1 %v1048_v34  ;;  %1021 = vmatpush.msra.mxu3 %v960_v52 }
 0x108   : > { %1060 = vmatpush.msrb.mxu0 %v1047_v35  ;;  %1002 = vmatpush.msra.mxu2 %v975_v62 }
 0x109   : > { %1260 = vmatpush.msrb.mxu1 %v1047_v35  ;;  %1022 = vmatpush.msra.mxu3 %v959_v55 }
 0x10a   : > { %1061 = vmatpush.msrb.mxu0 %v1046_v36  ;;  %1003 = vmatpush.msra.mxu2 %v974_v0 }
 0x10b   : > { %1261 = vmatpush.msrb.mxu1 %v1046_v36  ;;  %1023 = vmatpush.msra.mxu3 %v958_v58 }
 0x10c   : > { %1062 = vmatpush.msrb.mxu0 %v1045_v42  ;;  %1004 = vmatpush.msra.mxu2 %v973_v2 }
 0x10d   : > { %1262 = vmatpush.msrb.mxu1 %v1045_v42  ;;  %1024 = vmatpush.msra.mxu3 %v957_v61 }
 0x10e   : > { %1063 = vmatpush.msrb.mxu0 %v1044_v43 }
 0x10f   : > { %1263 = vmatpush.msrb.mxu1 %v1044_v43  ;;  %1025 = vmatpush.msra.mxu3 %v956_v63 }
 0x110   : > { %1064 = vmatpush.msrb.mxu0 %v1043_v44 }
 0x111   : > { %1264 = vmatpush.msrb.mxu1 %v1043_v44  ;;  %1026 = vmatpush.msra.mxu3 %v955_v1 }
 0x112   : > { %1065 = vmatpush.msrb.mxu0 %v1042_v47 }
 0x113   : > { %1265 = vmatpush.msrb.mxu1 %v1042_v47  ;;  %1027 = vmatpush.msra.mxu3 %v954_v3 }
 0x114   : > { %1066 = vmatpush.msrb.mxu0 %v1041_v50 }
 0x115   : > { %1266 = vmatpush.msrb.mxu1 %v1041_v50 }
 0x116   : > { %1067 = vmatpush.msrb.mxu0 %v1040_v53 }
 0x117   : > { %1267 = vmatpush.msrb.mxu1 %v1040_v53 }
 0x118   : > { %1068 = vmatpush.msrb.mxu0 %v1039_v56 }
 0x119   : > { %1268 = vmatpush.msrb.mxu1 %v1039_v56 }
 0x11a   : > { %1069 = vmatpush.msrb.mxu0 %v1038_v59 }
 0x11b   : > { %1269 = vmatpush.msrb.mxu1 %v1038_v59 }
 0x176   : > { %v795_v5 = vpop.f32.mrf.mxu2 }
 0x178   : > { %v730_v8 = vpop.f32.mrf.mxu0 }
 0x179   : > { %v753_v9 = vpop.f32.mrf.mxu1 }
 0x17a   : > { %v754_v11 = vadd.f32 %v753_v9, %v730_v8  ;;  %v1375_v8 = vld [vmem:[%s1946_s8] ss:$0 sm:$0xff] }
 0x17c   : > { %v801_v14 = vadd.f32 %v795_v5, %v754_v11 }
 0x17e   : > { %v807_v15 = vadd.f32 %v1374_v12, %v801_v14  ;;  %v798_v22 = vpop.f32.mrf.mxu2 }
 0x180   : > { %v809_v17 = vmax.f32 %v807_v15, 0.0  ;;  %v733_v18 = vpop.f32.mrf.mxu0 }
 0x181   : > { %v756_v19 = vpop.f32.mrf.mxu1 }
 0x182   : > { %v1887_v20 = vadd.f32 %v809_v17, %v532_v16  ;;  %v757_v21 = vadd.f32 %v756_v19, %v733_v18 }
 0x184   : > { %813 = vst [vmem:[#allocation2 + $0x8] sm:$0xff] %v1887_v20  ;;  %v802_v23 = vadd.f32 %v798_v22, %v757_v21  ;;  %933 = vmatmul.f32.vlgmr.msra.gmra.mxu1 %v1887_v20 }
 0x186   : > { %v808_v24 = vadd.f32 %v1374_v12, %v802_v23 }
 0x188   : > { %v810_v26 = vmax.f32 %v808_v24, 0.0 }
 0x18a   : > { %v1891_v28 = vadd.f32 %v810_v26, %v535_v25 }
 0x18b   : > { %v833_v29 = vld [vmem:[#allocation2 + $0x6] sm:$0xff] }
 0x18c   : > { %v815_v30 = vld [vmem:[#allocation2 + $0x4] sm:$0xff]  ;;  %814 = vst [vmem:[#allocation2 + $0x10] sm:$0xff] %v1891_v28  ;;  %868 = vmatmul.f32.vlgmr.msrb.gmra.mxu3 %v833_v29  ;;  %936 = vmatmul.f32.gmra.mxu1 %v1891_v28  ;;  %v1376_v29 = vld [vmem:[%s1948_s10] ss:$0 sm:$0xff] }
 0x18d   : > { %891 = vmatmul.f32.vlgmr.msra.gmra.mxu0 %v815_v30 }
 0x193   : > { %v834_v32 = vld [vmem:[#allocation2 + $0xe] sm:$0xff] }
 0x194   : > { %v816_v33 = vld [vmem:[#allocation2 + $0xc] sm:$0xff]  ;;  %871 = vmatmul.f32.gmra.mxu3 %v834_v32 }
 0x195   : > { %894 = vmatmul.f32.gmra.mxu0 %v816_v33 }
 0x201   : > { %v934_v5 = vpop.f32.mrf.mxu1 }
 0x209   : > { %v937_v15 = vpop.f32.mrf.mxu1 }
 0x20a   : > { %v892_v4 = vpop.f32.mrf.mxu0 }
 0x20f   : > { %v869_v6 = vpop.f32.mrf.mxu3 }
 0x210   : > { %v893_v7 = vadd.f32 %v892_v4, %v869_v6 }
 0x212   : > { %v940_v9 = vadd.f32 %v934_v5, %v893_v7  ;;  %v895_v12 = vpop.f32.mrf.mxu0 }
 0x214   : > { %v946_v10 = vadd.f32 %v1375_v8, %v940_v9 }
 0x216   : > { %v948_v11 = vmax.f32 %v946_v10, 0.0 }
 0x217   : > { %v872_v13 = vpop.f32.mrf.mxu3 }
 0x218   : > { %950 = vst [vmem:[#allocation3 + $0x8] sm:$0xff] %v948_v11  ;;  %v896_v14 = vadd.f32 %v895_v12, %v872_v13  ;;  %1070 = vmatmul.f32.vlgmr.msrb.gmra.mxu0 %v948_v11 }
 0x21a   : > { %v941_v16 = vadd.f32 %v937_v15, %v896_v14 }
 0x21c   : > { %v947_v17 = vadd.f32 %v1375_v8, %v941_v16 }
 0x21e   : > { %v949_v18 = vmax.f32 %v947_v17, 0.0 }
 0x21f   : > { %v970_v19 = vld [vmem:[#allocation3 + $0x6] sm:$0xff] }
 0x220   : > { %v952_v21 = vld [vmem:[#allocation3 + $0x4] sm:$0xff]  ;;  %951 = vst [vmem:[#allocation3 + $0x10] sm:$0xff] %v949_v18  ;;  %1005 = vmatmul.f32.vlgmr.msra.gmra.mxu2 %v970_v19  ;;  %1073 = vmatmul.f32.vlgmr.msrb.gmra.mxu1 %v949_v18 }
 0x221   : > { %1028 = vmatmul.f32.vlgmr.msra.gmra.mxu3 %v952_v21 }
 0x227   : > { %v971_v22 = vld [vmem:[#allocation3 + $0xe] sm:$0xff] }
 0x228   : > { %v953_v23 = vld [vmem:[#allocation3 + $0xc] sm:$0xff]  ;;  %1008 = vmatmul.f32.gmra.mxu2 %v971_v22 }
 0x229   : > { %1031 = vmatmul.f32.gmra.mxu3 %v953_v23 }
 0x295   : > { %v1071_v30 = vpop.f32.mrf.mxu0 }
 0x29d   : > { %v1074_v38 = vpop.f32.mrf.mxu1 }
 0x2a3   : > { %v1006_v24 = vpop.f32.mrf.mxu2 }
 0x2a4   : > { %v1029_v25 = vpop.f32.mrf.mxu3 }
 0x2a5   : > { %v1030_v26 = vadd.f32 %v1029_v25, %v1006_v24 }
 0x2a7   : > { %v1077_v32 = vadd.f32 %v1071_v30, %v1030_v26 }
 0x2a9   : > { %v1083_v33 = vadd.f32 %v1376_v29, %v1077_v32 }
 0x2ab   : > { %v1085_v27 = vmax.f32 %v1083_v33, 0.0  ;;  %v1009_v34 = vpop.f32.mrf.mxu2 }
 0x2ac   : > { %v1032_v35 = vpop.f32.mrf.mxu3 }
 0x2ad   : > { %v1087_v36 = vadd.f32 %v1085_v27, %v1887_v20  ;;  %v1033_v37 = vadd.f32 %v1032_v35, %v1009_v34 }
 0x2af   : > { %1089 = vst [vmem:[%s489_s5] sm:$0xff] %v1087_v36  ;;  %v1078_v31 = vadd.f32 %v1074_v38, %v1033_v37 }
 0x2b1   : > { %v1084_v39 = vadd.f32 %v1376_v29, %v1078_v31 }
 0x2b3   : > { %v1086_v40 = vmax.f32 %v1084_v39, 0.0 }
 0x2b5   : > { %v1088_v41 = vadd.f32 %v1086_v40, %v1891_v28 }
 0x2b7   : > { %1090 = vst [vmem:[%s489_s5 + $0x8] sm:$0xff] %v1088_v41 }
 0x2b8   : > { %1584 = shalt.err (!%p1581_p9)
}
 0x2b9   : > { %s1645_s29 = smov 128   ;;  %s1646_s30 = smov 8  }
 0x2ba   : > { %1292 = dma.vmem_to_hbm [thread:$0]  (%p1808_p13), %s1105_s25, 256, %s1107_s26, %s1092_s24, %s1645_s29, %s1645_s29, %s1646_s30  }
 0x2bb PF: > { %s1121_s9 = sand.u32 1, %s1623_s17   ;;  %p1970_p10 = scmp.ge.s32.totalorder %s1635_s20, 2 }
 0x2bc   : > { %s1122_s22 = scalar_lea.sflag [#allocation6], %s1121_s9 }
 0x2bd   : > { %p1315_p11 = pnand %p1970_p10, %p1813_p4 }
 0x2bf   : > { %p1316_p0 = pneg %p1315_p11 }
 0x2c1   : > { %1618 = dma.done.wait (%p1316_p0), %s1122_s22, 256  }
 0x2c2   : > { %1620 = vsyncadd (%p1316_p0), %s1122_s22, 4294967040  ;;  %p27_p2 = scmp.ge.s32.totalorder %s1788_s16, 4   ;;  %s1971_s17 = smov %s1627_s18 }
 0x2c3   : > { %s1972_s18 = smov %s1631_s19  ;;  %s1973_s19 = smov %s1800_s13 }
 0x2c4   : > { %s1974_s20 = smov %s1788_s16  ;;  %29 = sbr.rel (!%p27_p2) target bundleno = 14 (0xe), region = 137 }
 0x2c9   :  { %1128 = vsyncpa [#allocation5], 1 }
 0x2ca   :  { %1130 = vsyncpa [#allocation5 + $0x1], 1 }
 0x2cb   :  { %1131 = vsyncpa [#allocation8], 1 }
 0x2cc   :  { %1132 = vsyncpa [#allocation11], 1 }
 0x2cd   :  { %1133 = vsyncpa [#allocation14], 1 }
 0x2ce   :  { %1134 = vsyncpa [#allocation6], 1 }
 0x2cf   :  { %1136 = vsyncpa [#allocation6 + $0x1], 1 }

</bundles_post_ra>
